<compile_context>
chip_gen: v5e
topology: v5e:2x2
jax: 0.10.0
libtpu: 0.0.40
codegen_flags: <defaults>
</compile_context>

<pallas_src>
import jax
import jax.numpy as jnp
from jax.experimental import pallas as pl
from jax.experimental.pallas import tpu as pltpu

# ---------------- config (small, consistent with JambaConfig fields) ---------
HIDDEN_SIZE = 128
NUM_HEADS = 8
NUM_KV_HEADS = 4
HEAD_DIM = HIDDEN_SIZE // NUM_HEADS          # 16
Q_SIZE = NUM_HEADS * HEAD_DIM                # 128
KV_SIZE = NUM_KV_HEADS * HEAD_DIM            # 64
INTERMEDIATE_SIZE = 256
RMS_EPS = 1e-6
T = 16                                       # num tokens
SCALE = HEAD_DIM ** -0.5
GROUP = NUM_HEADS // NUM_KV_HEADS            # q-heads per kv-head


def _rmsnorm_f32(x, w):
    var = jnp.mean(x * x, axis=-1, keepdims=True)
    return x * jax.lax.rsqrt(var + RMS_EPS) * w


# ---------------- fused layer kernel ------------------------------------------

def _make_layer_kernel(has_residual: bool):
    """Builds the fused-layer kernel, specialized on whether a residual input
    tensor is present (avoids DMAing a zeros residual when residual is None)."""

    def kernel(*refs):
        if has_residual:
            (x_ref, res_in_ref, in_ln_w_ref, pre_ff_ln_w_ref,
             w_qkv_ref, w_o_ref, w_gu_ref, w_down_ref,
             out_ref, res_out_ref) = refs
        else:
            (x_ref, in_ln_w_ref, pre_ff_ln_w_ref,
             w_qkv_ref, w_o_ref, w_gu_ref, w_down_ref,
             out_ref, res_out_ref) = refs

        # ---- input_layernorm (fused residual add when residual is given) ----
        x = x_ref[...].astype(jnp.float32)
        if has_residual:
            x = x + res_in_ref[...].astype(jnp.float32)
        residual = x                                          # (T, H) f32
        h = _rmsnorm_f32(x, in_ln_w_ref[...].astype(jnp.float32))

        # ---- qkv projection (bf16 operands -> f32 MXU accumulation) ---------
        qkv = jnp.dot(h.astype(jnp.bfloat16), w_qkv_ref[...],
                      preferred_element_type=jnp.float32)     # (T, Q+2KV)

        t = x.shape[0]
        n_all_heads = NUM_HEADS + 2 * NUM_KV_HEADS

        # heads-batched layout built once: (heads, T, HEAD_DIM); q/k/v split is
        # a leading-dim slice (no per-head lane slicing, no concat later).
        qkv_h = jnp.transpose(qkv.reshape(t, n_all_heads, HEAD_DIM), (1, 0, 2))
        q_hd = (qkv_h[:NUM_HEADS] * SCALE).astype(jnp.bfloat16)          # (8,T,D)
        k_hd = qkv_h[NUM_HEADS:NUM_HEADS + NUM_KV_HEADS].astype(jnp.bfloat16)
        v_hd = qkv_h[NUM_HEADS + NUM_KV_HEADS:].astype(jnp.bfloat16)     # (4,T,D)

        # GQA: expand kv heads to q heads (q-head hd uses kv-head hd // GROUP).
        k_hd = jnp.broadcast_to(
            k_hd[:, None], (NUM_KV_HEADS, GROUP, t, HEAD_DIM)
        ).reshape(NUM_HEADS, t, HEAD_DIM)
        v_hd = jnp.broadcast_to(
            v_hd[:, None], (NUM_KV_HEADS, GROUP, t, HEAD_DIM)
        ).reshape(NUM_HEADS, t, HEAD_DIM)

        # additive causal bias computed once, added to the batched score tensor
        row = jax.lax.broadcasted_iota(jnp.int32, (t, t), 0)
        col = jax.lax.broadcasted_iota(jnp.int32, (t, t), 1)
        bias = jnp.where(col <= row, 0.0, -1e30).astype(jnp.float32)      # (T,T)

        # ---- causal GQA attention (bf16 MXU ops, f32 softmax math) ----------
        s = jnp.einsum('hqd,hkd->hqk', q_hd, k_hd,
                       preferred_element_type=jnp.float32)                # (8,T,T)
        s = s + bias[None]
        m = jnp.max(s, axis=-1, keepdims=True)
        p = jnp.exp(s - m)
        l = jnp.sum(p, axis=-1, keepdims=True)
        p = (p * pl.reciprocal(l, approx=True)).astype(jnp.bfloat16)      # EUP slot

        ctx = jnp.einsum('hqk,hkd->hqd', p, v_hd,
                         preferred_element_type=jnp.float32)              # (8,T,D)
        attn = jnp.transpose(ctx, (1, 0, 2)).reshape(t, Q_SIZE)           # (T,128)

        # ---- o_proj ----------------------------------------------------------
        o = jnp.dot(attn.astype(jnp.bfloat16), w_o_ref[...],
                    preferred_element_type=jnp.float32)                   # (T, H)

        # ---- pre_ff_layernorm (fused residual add) ---------------------------
        x2 = o + residual
        res_out_ref[...] = x2
        h2 = _rmsnorm_f32(x2, pre_ff_ln_w_ref[...].astype(jnp.float32))

        # ---- JambaMLP (num_experts == 1): gate_up -> SiluAndMul -> down ------
        gate_up = jnp.dot(h2.astype(jnp.bfloat16), w_gu_ref[...],
                          preferred_element_type=jnp.float32)             # (T, 2I)
        inter = gate_up.shape[-1] // 2
        gate = gate_up[:, :inter]
        up = gate_up[:, inter:]
        act = gate * jax.nn.sigmoid(gate) * up                            # SiLU*mul

        out_ref[...] = jnp.dot(act.astype(jnp.bfloat16), w_down_ref[...],
                               preferred_element_type=jnp.float32
                               ).astype(out_ref.dtype)                    # (T, H)

    return kernel


_KERNEL_NO_RES = _make_layer_kernel(has_residual=False)
_KERNEL_RES = _make_layer_kernel(has_residual=True)


# ---------------- wrapper ------------------------------------------------------

def _full_spec(shape):
    nd = len(shape)
    return pl.BlockSpec(shape, lambda i, _nd=nd: (0,) * _nd)


@jax.jit
def jamba_attention_decoder_layer(positions, hidden_states, params,
                                  residual=None):
    del positions  # unused by Jamba attention layers (no rotary embedding)

    t, h = hidden_states.shape
    has_res = residual is not None
    kernel = _KERNEL_RES if has_res else _KERNEL_NO_RES

    data_inputs = [hidden_states] + ([residual] if has_res else [])
    weight_inputs = [params["input_ln_w"], params["pre_ff_ln_w"],
                     params["w_qkv"], params["w_o"],
                     params["w_gate_up"], params["w_down"]]
    all_inputs = data_inputs + weight_inputs

    out, res_out = pl.pallas_call(
        kernel,
        out_shape=(jax.ShapeDtypeStruct((t, h), jnp.bfloat16),   # layer output
                   jax.ShapeDtypeStruct((t, h), jnp.float32)),   # residual (f32 chain)
        grid=(1,),
        in_specs=[_full_spec(a.shape) for a in all_inputs],
        out_specs=(_full_spec((t, h)), _full_spec((t, h))),
        compiler_params=pltpu.CompilerParams(
            dimension_semantics=("arbitrary",)),
    )(*all_inputs)
    return out, res_out


# ---------------- params & pure-JAX reference ----------------------------------

def init_params(key):
    ks = jax.random.split(key, 4)
    scale = 0.02

    def w(k, shape):
        # projection weights stored bf16 (MXU-native operand dtype)
        return (scale * jax.random.normal(k, shape, jnp.float32)).astype(jnp.bfloat16)

    return {
        "input_ln_w":  jnp.ones((1, HIDDEN_SIZE), jnp.float32),
        "pre_ff_ln_w": jnp.ones((1, HIDDEN_SIZE), jnp.float32),
        "w_qkv":     w(ks[0], (HIDDEN_SIZE, Q_SIZE + 2 * KV_SIZE)),
        "w_o":       w(ks[1], (Q_SIZE, HIDDEN_SIZE)),
        "w_gate_up": w(ks[2], (HIDDEN_SIZE, 2 * INTERMEDIATE_SIZE)),
        "w_down":    w(ks[3], (INTERMEDIATE_SIZE, HIDDEN_SIZE)),
    }


def _reference(hidden_states, params, residual=None):
    x = hidden_states.astype(jnp.float32)
    if residual is not None:
        x = x + residual.astype(jnp.float32)
    res = x
    h = _rmsnorm_f32(x, params["input_ln_w"].astype(jnp.float32))
    qkv = jnp.dot(h.astype(jnp.bfloat16), params["w_qkv"],
                  preferred_element_type=jnp.float32)
    q = qkv[:, :Q_SIZE]
    k = qkv[:, Q_SIZE:Q_SIZE + KV_SIZE]
    v = qkv[:, Q_SIZE + KV_SIZE:]
    t = x.shape[0]
    mask = jnp.tril(jnp.ones((t, t), bool))
    outs = []
    for hd in range(NUM_HEADS):
        g = hd // GROUP
        qh = q[:, hd * HEAD_DIM:(hd + 1) * HEAD_DIM]
        kh = k[:, g * HEAD_DIM:(g + 1) * HEAD_DIM]
        vh = v[:, g * HEAD_DIM:(g + 1) * HEAD_DIM]
        s = jnp.dot(qh, kh.T, preferred_element_type=jnp.float32) * SCALE
        s = jnp.where(mask, s, -1e30)
        p = jax.nn.softmax(s, axis=-1)
        outs.append(jnp.dot(p, vh, preferred_element_type=jnp.float32))
    attn = jnp.concatenate(outs, axis=-1)
    o = jnp.dot(attn.astype(jnp.bfloat16), params["w_o"],
                preferred_element_type=jnp.float32)
    x2 = o + res
    h2 = _rmsnorm_f32(x2, params["pre_ff_ln_w"].astype(jnp.float32))
    gu = jnp.dot(h2.astype(jnp.bfloat16), params["w_gate_up"],
                 preferred_element_type=jnp.float32)
    gate, up = gu[:, :INTERMEDIATE_SIZE], gu[:, INTERMEDIATE_SIZE:]
    act = gate * jax.nn.sigmoid(gate) * up
    out = jnp.dot(act.astype(jnp.bfloat16), params["w_down"],
                  preferred_element_type=jnp.float32)
    return out, x2


# ---------------- main ----------------------------------------------------------

if __name__ == "__main__":
    key = jax.random.PRNGKey(0)
    pkey, xkey, rkey = jax.random.split(key, 3)
    params = init_params(pkey)

    hidden_states = jax.random.normal(xkey, (T, HIDDEN_SIZE), jnp.float32)
    residual0 = jax.random.normal(rkey, (T, HIDDEN_SIZE), jnp.float32)
    positions = jnp.arange(T, dtype=jnp.int32)

    # path 1: first attention layer in the stack (residual is None)
    out1, res1 = jamba_attention_decoder_layer(positions, hidden_states,
                                               params, residual=None)
    # path 2: fused residual-add path
    out2, res2 = jamba_attention_decoder_layer(positions, hidden_states,
                                               params, residual=residual0)
    jax.block_until_ready((out1, res1, out2, res2))

    assert out1.shape == (T, HIDDEN_SIZE) and res1.shape == (T, HIDDEN_SIZE)
    for a in (out1, res1, out2, res2):
        assert bool(jnp.all(jnp.isfinite(a.astype(jnp.float32))))

    ref_out1, ref_res1 = _reference(hidden_states, params, residual=None)
    ref_out2, ref_res2 = _reference(hidden_states, params, residual=residual0)

    for got, ref in ((out1, ref_out1), (res1, ref_res1),
                     (out2, ref_out2), (res2, ref_res2)):
        err = float(jnp.max(jnp.abs(got.astype(jnp.float32) - ref)))
        assert err < 1e-2, err

    print("KERNEL_OK")
</pallas_src>

<mosaic_0001>
module attributes {stable_mosaic.version = 11 : i64} {
  func.func @kernel(%arg0: i32, %arg1: memref<16x128xf32, #tpu.memory_space<vmem>>, %arg2: memref<1x128xf32, #tpu.memory_space<vmem>>, %arg3: memref<1x128xf32, #tpu.memory_space<vmem>>, %arg4: memref<128x256xbf16, #tpu.memory_space<vmem>>, %arg5: memref<128x128xbf16, #tpu.memory_space<vmem>>, %arg6: memref<128x512xbf16, #tpu.memory_space<vmem>>, %arg7: memref<256x128xbf16, #tpu.memory_space<vmem>>, %arg8: memref<16x128xbf16, #tpu.memory_space<vmem>>, %arg9: memref<16x128xf32, #tpu.memory_space<vmem>>) attributes {dimension_semantics = [#tpu.dimension_semantics<arbitrary>], iteration_bounds = array<i64: 1>, scalar_prefetch = 0 : i64, scratch_operands = 0 : i64, tpu.core_type = #tpu.core_type<tc>, window_params = [{pipeline_mode = #tpu.pipeline_mode<synchronous>, transform_indices = @transform_0, window_bounds = array<i64: 16, 128>}, {pipeline_mode = #tpu.pipeline_mode<synchronous>, transform_indices = @transform_1, window_bounds = array<i64: 1, 128>}, {pipeline_mode = #tpu.pipeline_mode<synchronous>, transform_indices = @transform_2, window_bounds = array<i64: 1, 128>}, {pipeline_mode = #tpu.pipeline_mode<synchronous>, transform_indices = @transform_3, window_bounds = array<i64: 128, 256>}, {pipeline_mode = #tpu.pipeline_mode<synchronous>, transform_indices = @transform_4, window_bounds = array<i64: 128, 128>}, {pipeline_mode = #tpu.pipeline_mode<synchronous>, transform_indices = @transform_5, window_bounds = array<i64: 128, 512>}, {pipeline_mode = #tpu.pipeline_mode<synchronous>, transform_indices = @transform_6, window_bounds = array<i64: 256, 128>}, {pipeline_mode = #tpu.pipeline_mode<synchronous>, transform_indices = @transform_7, window_bounds = array<i64: 16, 128>}, {pipeline_mode = #tpu.pipeline_mode<synchronous>, transform_indices = @transform_8, window_bounds = array<i64: 16, 128>}]} {
    %c0 = arith.constant 0 : index
    %c0_0 = arith.constant 0 : index
    %0 = vector.load %arg1[%c0, %c0_0] : memref<16x128xf32, #tpu.memory_space<vmem>>, vector<16x128xf32>
    %c0_1 = arith.constant 0 : index
    %c0_2 = arith.constant 0 : index
    %1 = vector.load %arg2[%c0_1, %c0_2] : memref<1x128xf32, #tpu.memory_space<vmem>>, vector<1x128xf32>
    %2 = arith.mulf %0, %0 : vector<16x128xf32>
    %cst = arith.constant dense<0.000000e+00> : vector<16xf32>
    %3 = vector.multi_reduction <add>, %2, %cst [1] : vector<16x128xf32> to vector<16xf32>
    %4 = vector.shape_cast %3 : vector<16xf32> to vector<16x1xf32>
    %cst_3 = arith.constant 1.280000e+02 : f32
    %5 = vector.broadcast %cst_3 : f32 to vector<16x1xf32>
    %6 = arith.divf %4, %5 : vector<16x1xf32>
    %cst_4 = arith.constant 9.99999997E-7 : f32
    %7 = vector.broadcast %cst_4 : f32 to vector<16x1xf32>
    %8 = arith.addf %6, %7 : vector<16x1xf32>
    %9 = math.rsqrt %8 : vector<16x1xf32>
    %10 = vector.broadcast %9 : vector<16x1xf32> to vector<16x128xf32>
    %11 = arith.mulf %0, %10 : vector<16x128xf32>
    %12 = vector.broadcast %1 : vector<1x128xf32> to vector<16x128xf32>
    %13 = arith.mulf %11, %12 : vector<16x128xf32>
    %14 = arith.truncf %13 : vector<16x128xf32> to vector<16x128xbf16>
    %c0_5 = arith.constant 0 : index
    %c0_6 = arith.constant 0 : index
    %15 = vector.load %arg4[%c0_5, %c0_6] : memref<128x256xbf16, #tpu.memory_space<vmem>>, vector<128x256xbf16>
    %cst_7 = arith.constant dense<0.000000e+00> : vector<16x256xf32>
    %16 = tpu.matmul %14, %15, %cst_7 {dimension_numbers = #tpu.dot_dimension_numbers<[1], [0], [0], [1], [0, 0, 1, 1], [], []>} : vector<16x128xbf16>, vector<128x256xbf16>, vector<16x256xf32> -> vector<16x256xf32>
    %17 = vector.shape_cast %16 : vector<16x256xf32> to vector<16x16x16xf32>
    %18 = tpu.transpose %17, [1, 0, 2] : vector<16x16x16xf32> -> vector<16x16x16xf32>
    %19 = vector.extract_strided_slice %18 {offsets = [0, 0, 0], sizes = [8, 16, 16], strides = [1, 1, 1]} : vector<16x16x16xf32> to vector<8x16x16xf32>
    %cst_8 = arith.constant 2.500000e-01 : f32
    %20 = vector.broadcast %cst_8 : f32 to vector<8x16x16xf32>
    %21 = arith.mulf %19, %20 : vector<8x16x16xf32>
    %22 = arith.truncf %21 : vector<8x16x16xf32> to vector<8x16x16xbf16>
    %23 = vector.extract_strided_slice %18 {offsets = [8, 0, 0], sizes = [4, 16, 16], strides = [1, 1, 1]} : vector<16x16x16xf32> to vector<4x16x16xf32>
    %24 = arith.truncf %23 : vector<4x16x16xf32> to vector<4x16x16xbf16>
    %25 = vector.extract_strided_slice %18 {offsets = [12, 0, 0], sizes = [4, 16, 16], strides = [1, 1, 1]} : vector<16x16x16xf32> to vector<4x16x16xf32>
    %26 = arith.truncf %25 : vector<4x16x16xf32> to vector<4x16x16xbf16>
    %27 = vector.shape_cast %24 : vector<4x16x16xbf16> to vector<4x1x16x16xbf16>
    %28 = vector.shape_cast %27 : vector<4x1x16x16xbf16> to vector<4x1x16x16xbf16>
    %29 = vector.broadcast %28 : vector<4x1x16x16xbf16> to vector<4x2x16x16xbf16>
    %30 = vector.shape_cast %29 : vector<4x2x16x16xbf16> to vector<8x16x16xbf16>
    %31 = vector.shape_cast %26 : vector<4x16x16xbf16> to vector<4x1x16x16xbf16>
    %32 = vector.shape_cast %31 : vector<4x1x16x16xbf16> to vector<4x1x16x16xbf16>
    %33 = vector.broadcast %32 : vector<4x1x16x16xbf16> to vector<4x2x16x16xbf16>
    %34 = vector.shape_cast %33 : vector<4x2x16x16xbf16> to vector<8x16x16xbf16>
    %35 = tpu.iota {dimensions = array<i32: 0>} : vector<16x16xi32>
    %36 = tpu.iota {dimensions = array<i32: 1>} : vector<16x16xi32>
    %37 = arith.cmpi sle, %36, %35 : vector<16x16xi32>
    %cst_9 = arith.constant 0.000000e+00 : f32
    %cst_10 = arith.constant -1.000000e+30 : f32
    %38 = vector.broadcast %cst_9 : f32 to vector<16x16xf32>
    %39 = vector.broadcast %cst_10 : f32 to vector<16x16xf32>
    %40 = arith.select %37, %38, %39 : vector<16x16xi1>, vector<16x16xf32>
    "tpu.trace_start"() <{level = 10 : i32, message = "hqd,hkd->hqk"}> : () -> ()
    %cst_11 = arith.constant dense<0.000000e+00> : vector<8x16x16xf32>
    %41 = tpu.matmul %22, %30, %cst_11 {dimension_numbers = #tpu.dot_dimension_numbers<[2], [2], [1], [1], [0, 0, 0, 1, 1, 1], [0], [0]>} : vector<8x16x16xbf16>, vector<8x16x16xbf16>, vector<8x16x16xf32> -> vector<8x16x16xf32>
    "tpu.trace_stop"() : () -> ()
    %42 = vector.shape_cast %40 : vector<16x16xf32> to vector<1x16x16xf32>
    %43 = vector.broadcast %42 : vector<1x16x16xf32> to vector<8x16x16xf32>
    %44 = arith.addf %41, %43 : vector<8x16x16xf32>
    %cst_12 = arith.constant dense<0xFF800000> : vector<8x16xf32>
    %45 = vector.multi_reduction <maximumf>, %44, %cst_12 [2] : vector<8x16x16xf32> to vector<8x16xf32>
    %46 = vector.shape_cast %45 : vector<8x16xf32> to vector<8x16x1xf32>
    %47 = vector.broadcast %46 : vector<8x16x1xf32> to vector<8x16x16xf32>
    %48 = arith.subf %44, %47 : vector<8x16x16xf32>
    %49 = math.exp %48 : vector<8x16x16xf32>
    %cst_13 = arith.constant dense<0.000000e+00> : vector<8x16xf32>
    %50 = vector.multi_reduction <add>, %49, %cst_13 [2] : vector<8x16x16xf32> to vector<8x16xf32>
    %51 = vector.shape_cast %50 : vector<8x16xf32> to vector<8x16x1xf32>
    %52 = tpu.reciprocal %51 {approx = true} : vector<8x16x1xf32> -> vector<8x16x1xf32>
    %53 = vector.broadcast %52 : vector<8x16x1xf32> to vector<8x16x16xf32>
    %54 = arith.mulf %49, %53 : vector<8x16x16xf32>
    %55 = arith.truncf %54 : vector<8x16x16xf32> to vector<8x16x16xbf16>
    "tpu.trace_start"() <{level = 10 : i32, message = "hqk,hkd->hqd"}> : () -> ()
    %cst_14 = arith.constant dense<0.000000e+00> : vector<8x16x16xf32>
    %56 = tpu.matmul %55, %34, %cst_14 {dimension_numbers = #tpu.dot_dimension_numbers<[2], [1], [1], [2], [0, 0, 0, 1, 1, 2], [0], [0]>} : vector<8x16x16xbf16>, vector<8x16x16xbf16>, vector<8x16x16xf32> -> vector<8x16x16xf32>
    "tpu.trace_stop"() : () -> ()
    %57 = tpu.transpose %56, [1, 0, 2] : vector<8x16x16xf32> -> vector<16x8x16xf32>
    %58 = vector.shape_cast %57 : vector<16x8x16xf32> to vector<16x128xf32>
    %59 = arith.truncf %58 : vector<16x128xf32> to vector<16x128xbf16>
    %c0_15 = arith.constant 0 : index
    %c0_16 = arith.constant 0 : index
    %60 = vector.load %arg5[%c0_15, %c0_16] : memref<128x128xbf16, #tpu.memory_space<vmem>>, vector<128x128xbf16>
    %cst_17 = arith.constant dense<0.000000e+00> : vector<16x128xf32>
    %61 = tpu.matmul %59, %60, %cst_17 {dimension_numbers = #tpu.dot_dimension_numbers<[1], [0], [0], [1], [0, 0, 1, 1], [], []>} : vector<16x128xbf16>, vector<128x128xbf16>, vector<16x128xf32> -> vector<16x128xf32>
    %62 = arith.addf %61, %0 : vector<16x128xf32>
    %c0_18 = arith.constant 0 : index
    %c0_19 = arith.constant 0 : index
    %63 = vector.load %arg9[%c0_18, %c0_19] : memref<16x128xf32, #tpu.memory_space<vmem>>, vector<16x128xf32>
    tpu.vector_store %arg9[%c0_18, %c0_19], %62 {strides = array<i32>} : memref<16x128xf32, #tpu.memory_space<vmem>>, vector<16x128xf32>,
    %c0_20 = arith.constant 0 : index
    %c0_21 = arith.constant 0 : index
    %64 = vector.load %arg3[%c0_20, %c0_21] : memref<1x128xf32, #tpu.memory_space<vmem>>, vector<1x128xf32>
    %65 = arith.mulf %62, %62 : vector<16x128xf32>
    %cst_22 = arith.constant dense<0.000000e+00> : vector<16xf32>
    %66 = vector.multi_reduction <add>, %65, %cst_22 [1] : vector<16x128xf32> to vector<16xf32>
    %67 = vector.shape_cast %66 : vector<16xf32> to vector<16x1xf32>
    %cst_23 = arith.constant 1.280000e+02 : f32
    %68 = vector.broadcast %cst_23 : f32 to vector<16x1xf32>
    %69 = arith.divf %67, %68 : vector<16x1xf32>
    %cst_24 = arith.constant 9.99999997E-7 : f32
    %70 = vector.broadcast %cst_24 : f32 to vector<16x1xf32>
    %71 = arith.addf %69, %70 : vector<16x1xf32>
    %72 = math.rsqrt %71 : vector<16x1xf32>
    %73 = vector.broadcast %72 : vector<16x1xf32> to vector<16x128xf32>
    %74 = arith.mulf %62, %73 : vector<16x128xf32>
    %75 = vector.broadcast %64 : vector<1x128xf32> to vector<16x128xf32>
    %76 = arith.mulf %74, %75 : vector<16x128xf32>
    %77 = arith.truncf %76 : vector<16x128xf32> to vector<16x128xbf16>
    %c0_25 = arith.constant 0 : index
    %c0_26 = arith.constant 0 : index
    %78 = vector.load %arg6[%c0_25, %c0_26] : memref<128x512xbf16, #tpu.memory_space<vmem>>, vector<128x512xbf16>
    %cst_27 = arith.constant dense<0.000000e+00> : vector<16x512xf32>
    %79 = tpu.matmul %77, %78, %cst_27 {dimension_numbers = #tpu.dot_dimension_numbers<[1], [0], [0], [1], [0, 0, 1, 1], [], []>} : vector<16x128xbf16>, vector<128x512xbf16>, vector<16x512xf32> -> vector<16x512xf32>
    %80 = vector.extract_strided_slice %79 {offsets = [0, 0], sizes = [16, 256], strides = [1, 1]} : vector<16x512xf32> to vector<16x256xf32>
    %81 = vector.extract_strided_slice %79 {offsets = [0, 256], sizes = [16, 256], strides = [1, 1]} : vector<16x512xf32> to vector<16x256xf32>
    %82 = arith.negf %80 : vector<16x256xf32>
    %83 = math.exp %82 : vector<16x256xf32>
    %cst_28 = arith.constant 1.000000e+00 : f32
    %84 = vector.broadcast %cst_28 : f32 to vector<16x256xf32>
    %85 = arith.addf %84, %83 : vector<16x256xf32>
    %86 = arith.divf %84, %85 : vector<16x256xf32>
    %87 = arith.mulf %80, %86 : vector<16x256xf32>
    %88 = arith.mulf %87, %81 : vector<16x256xf32>
    %89 = arith.truncf %88 : vector<16x256xf32> to vector<16x256xbf16>
    %c0_29 = arith.constant 0 : index
    %c0_30 = arith.constant 0 : index
    %90 = vector.load %arg7[%c0_29, %c0_30] : memref<256x128xbf16, #tpu.memory_space<vmem>>, vector<256x128xbf16>
    %cst_31 = arith.constant dense<0.000000e+00> : vector<16x128xf32>
    %91 = tpu.matmul %89, %90, %cst_31 {dimension_numbers = #tpu.dot_dimension_numbers<[1], [0], [0], [1], [0, 0, 1, 1], [], []>} : vector<16x256xbf16>, vector<256x128xbf16>, vector<16x128xf32> -> vector<16x128xf32>
    %92 = arith.truncf %91 : vector<16x128xf32> to vector<16x128xbf16>
    %c0_32 = arith.constant 0 : index
    %c0_33 = arith.constant 0 : index
    %93 = vector.load %arg8[%c0_32, %c0_33] : memref<16x128xbf16, #tpu.memory_space<vmem>>, vector<16x128xbf16>
    tpu.vector_store %arg8[%c0_32, %c0_33], %92 {strides = array<i32>} : memref<16x128xbf16, #tpu.memory_space<vmem>>, vector<16x128xbf16>,
    return
  }
  func.func @transform_0(%arg0: i32) -> (i32, i32) {
    %c0_i32 = arith.constant 0 : i32
    %c0_i32_0 = arith.constant 0 : i32
    %c0_i32_1 = arith.constant 0 : i32
    return %c0_i32, %c0_i32_0 : i32, i32
  }
  func.func @transform_1(%arg0: i32) -> (i32, i32) {
    %c0_i32 = arith.constant 0 : i32
    %c0_i32_0 = arith.constant 0 : i32
    %c0_i32_1 = arith.constant 0 : i32
    return %c0_i32, %c0_i32_0 : i32, i32
  }
  func.func @transform_2(%arg0: i32) -> (i32, i32) {
    %c0_i32 = arith.constant 0 : i32
    %c0_i32_0 = arith.constant 0 : i32
    %c0_i32_1 = arith.constant 0 : i32
    return %c0_i32, %c0_i32_0 : i32, i32
  }
  func.func @transform_3(%arg0: i32) -> (i32, i32) {
    %c0_i32 = arith.constant 0 : i32
    %c0_i32_0 = arith.constant 0 : i32
    %c0_i32_1 = arith.constant 0 : i32
    return %c0_i32, %c0_i32_0 : i32, i32
  }
  func.func @transform_4(%arg0: i32) -> (i32, i32) {
    %c0_i32 = arith.constant 0 : i32
    %c0_i32_0 = arith.constant 0 : i32
    %c0_i32_1 = arith.constant 0 : i32
    return %c0_i32, %c0_i32_0 : i32, i32
  }
  func.func @transform_5(%arg0: i32) -> (i32, i32) {
    %c0_i32 = arith.constant 0 : i32
    %c0_i32_0 = arith.constant 0 : i32
    %c0_i32_1 = arith.constant 0 : i32
    return %c0_i32, %c0_i32_0 : i32, i32
  }
  func.func @transform_6(%arg0: i32) -> (i32, i32) {
    %c0_i32 = arith.constant 0 : i32
    %c0_i32_0 = arith.constant 0 : i32
    %c0_i32_1 = arith.constant 0 : i32
    return %c0_i32, %c0_i32_0 : i32, i32
  }
  func.func @transform_7(%arg0: i32) -> (i32, i32) {
    %c0_i32 = arith.constant 0 : i32
    %c0_i32_0 = arith.constant 0 : i32
    %c0_i32_1 = arith.constant 0 : i32
    return %c0_i32, %c0_i32_0 : i32, i32
  }
  func.func @transform_8(%arg0: i32) -> (i32, i32) {
    %c0_i32 = arith.constant 0 : i32
    %c0_i32_0 = arith.constant 0 : i32
    %c0_i32_1 = arith.constant 0 : i32
    return %c0_i32, %c0_i32_0 : i32, i32
  }
}

</mosaic_0001>

<bundles_post_ra>
// kernel: jamba_attention_decoder_layer.1
= control target key start
LH: loop header
LB: loop body
LE: loop exit
PB: predicated region body
PF: predicated region fallthrough
CT: control target
= control target key end

     0   :  { %14 = vsyncpa [#allocation3], 0  ;;  %s5397_s0 = inlined_call_operand.hbm [shape: f32[16,128], index: 0, kind: input, shape index: {}]   ;;  %s5398_s1 = inlined_call_operand.hbm [shape: f32[1,128], index: 1, kind: input, shape index: {}]   ;;  %s5399_s2 = inlined_call_operand.vmem [shape: f32[1,128], index: 2, kind: input, shape index: {}]   ;;  %s5400_s3 = inlined_call_operand.hbm [shape: bf16[128,256], index: 3, kind: input, shape index: {}]   ;;  %s5401_s4 = inlined_call_operand.hbm [shape: bf16[128,128], index: 4, kind: input, shape index: {}]   ;;  %s5402_s5 = inlined_call_operand.hbm [shape: bf16[128,512], index: 5, kind: input, shape index: {}]   ;;  %s5403_s6 = inlined_call_operand.hbm [shape: bf16[256,128], index: 6, kind: input, shape index: {}]   ;;  %s5404_s7 = inlined_call_operand.hbm [shape: bf16[16,128], index: 7, kind: output, shape index: {0}]   ;;  %s5405_s8 = inlined_call_operand.hbm [shape: f32[16,128], index: 8, kind: output, shape index: {1}]  }
   0x1   :  { %15 = vsyncpa [#allocation6], 0 }
   0x2   :  { %16 = vsyncpa [#allocation9], 0 }
   0x3   :  { %17 = vsyncpa [#allocation12], 0 }
   0x4   :  { %18 = vsyncpa [#allocation4], 0  ;;  %s38_s29 = sshll.u32 %s5398_s1, 4  ;;  %s39_s29 = int_to_ptr.hbm [resolvable:$true] %s38_s29 }
   0x5   :  { %19 = vsyncpa [#allocation15], 0  ;;  %s3892_s30 = smov [#allocation5]   ;;  %s63_s12 = sshll.u32 %s5401_s4, 4  ;;  %s64_s12 = int_to_ptr.hbm [resolvable:$true] %s63_s12 }
   0x6   :  { %s40_s9 = sshll.u32 %s3892_s30, 4  ;;  %s3893_s13 = smov [#allocation8]   ;;  %s41_s9 = int_to_ptr.vmem [resolvable:$true] %s40_s9 }
   0x7   :  { %43 = dma.hbm_to_vmem [thread:$0]  %s39_s29, 16, %s41_s9, [#allocation6]  }
   0x8   :  { %s65_s14 = sshll.u32 %s3893_s13, 4  ;;  %s3894_s15 = smov 64   ;;  %s66_s14 = int_to_ptr.vmem [resolvable:$true] %s65_s14 }
   0x9   :  { %s3895_s16 = smov 4   ;;  %s24_s18 = sshll.u32 %s5397_s0, 4  ;;  %s25_s18 = int_to_ptr.hbm [resolvable:$true] %s24_s18 }
   0xa   :  { %71 = dma.hbm_to_vmem [thread:$0]  %s64_s12, 1024, %s66_s14, [#allocation9], %s3894_s15, %s3894_s15, %s3895_s16  }
   0xb   :  { %s3896_s19 = smov [#allocation2]   ;;  %s50_s22 = sshll.u32 %s5400_s3, 4  ;;  %s51_s22 = int_to_ptr.hbm [resolvable:$true] %s50_s22 }
   0xc   :  { %s26_s20 = sshll.u32 %s3896_s19, 4  ;;  %s3897_s23 = smov 128   ;;  %s27_s20 = int_to_ptr.vmem [resolvable:$true] %s26_s20 }
   0xd   :  { %s3898_s24 = smov 8   ;;  %s3899_s25 = smov [#allocation7]  }
   0xe   :  { %32 = dma.hbm_to_vmem [thread:$0]  %s25_s18, 256, %s27_s20, [#allocation3], %s3897_s23, %s3897_s23, %s3898_s24  }
   0xf   :  { %s52_s26 = sshll.u32 %s3899_s25, 4  ;;  %s76_s0 = sshll.u32 %s5402_s5, 4  ;;  %s53_s26 = int_to_ptr.vmem [resolvable:$true] %s52_s26  ;;  %s77_s0 = int_to_ptr.hbm [resolvable:$true] %s76_s0 }
  0x10   :  { %58 = dma.hbm_to_vmem [thread:$0]  %s51_s22, 2048, %s53_s26, [#allocation6], %s3897_s23, %s3897_s23, %s3898_s24  }
  0x11   :  { %s3900_s3 = smov [#allocation10]   ;;  %s89_s10 = sshll.u32 %s5403_s6, 4  ;;  %s90_s10 = int_to_ptr.hbm [resolvable:$true] %s89_s10 }
  0x12   :  { %s78_s29 = sshll.u32 %s3900_s3, 4  ;;  %s3901_s11 = smov 256   ;;  %s79_s29 = int_to_ptr.vmem [resolvable:$true] %s78_s29 }
  0x13   :  { %s3902_s12 = smov 16   ;;  %s3903_s13 = smov [#allocation11]  }
  0x14   :  { %84 = dma.hbm_to_vmem [thread:$0]  %s77_s0, 4096, %s79_s29, [#allocation9], %s3901_s11, %s3901_s11, %s3902_s12  }
  0x15   :  { %s91_s5 = sshll.u32 %s3903_s13, 4  ;;  %s92_s5 = int_to_ptr.vmem [resolvable:$true] %s91_s5 }
  0x16   :  { %97 = dma.hbm_to_vmem [thread:$0]  %s90_s10, 2048, %s92_s5, [#allocation12], %s3894_s15, %s3894_s15, %s3895_s16  }
  0x17   :  { %3880 = dma.done.wait [#allocation3], 256  }
  0x18   :  { %3881 = vsyncadd [#allocation3], 4294967040 }
  0x19   :  { %3882 = dma.done.wait [#allocation6], 2064  }
  0x1a   :  { %3883 = vsyncadd [#allocation6], 4294965232 }
  0x1b   :  { %3884 = dma.done.wait [#allocation9], 5120  }
  0x1c   :  { %3885 = vsyncadd [#allocation9], 4294962176 }
  0x1d   :  { %3886 = dma.done.wait [#allocation12], 2048  }
  0x1e   :  { %3887 = vsyncadd [#allocation12], 4294965248  ;;  %v3991_v0 = vld [vmem:[#allocation2] sm:$0xff]  ;;  %v3995_v2 = vld [vmem:[#allocation2 + $0x8] sm:$0xff]  ;;  %v3904_v9 = vmov 128.0   ;;  %s3905_s6 = smov 80  }
  0x1f   :  { %v126_v1 = vmul.f32 %v3991_v0, %v3991_v0  ;;  %v127_v3 = vmul.f32 %v3995_v2, %v3995_v2  ;;  %v3174_v4 = vld [vmem:[#allocation7 + $0x70] sm:$0xf]  ;;  %v3439_v5 = vld [vmem:[#allocation7 + $0x74] sm:$0xf0]  ;;  %v3438_v6 = vld [vmem:[#allocation7 + $0x74] sm:$0xf]  ;;  %3596 = vrcp.f32 %v3904_v9 }
  0x20   :  { %v3175_v7 = vor.u32 %v3439_v5, %v3174_v4  ;;  %v3176_v8 = vld [vmem:[#allocation7 + $0x78] sm:$0xf0]  ;;  %v3166_v11 = vld [vmem:[#allocation7 + $0x60] sm:$0xf]  ;;  %v3437_v12 = vld [vmem:[#allocation7 + $0x64] sm:$0xf0] }
  0x21   :  { %128 = vadd.xlane.f32.xlu0 %v126_v1  ;;  %v3179_v10 = vor.u32 %v3438_v6, %v3176_v8  ;;  %v3436_v13 = vld [vmem:[#allocation7 + $0x64] sm:$0xf]  ;;  %v3167_v14 = vor.u32 %v3437_v12, %v3166_v11  ;;  %v3168_v15 = vld [vmem:[#allocation7 + $0x68] sm:$0xf0]  ;;  %v3158_v18 = vld [vmem:[#allocation7 + $0x50] sm:$0xf] }
  0x22   :  { %267 = vmatpush.bf16.msra.mxu0 %v3175_v7  ;;  %v3171_v16 = vor.u32 %v3436_v13, %v3168_v15  ;;  %v3435_v19 = vld [vmem:[#allocation7 + $0x54] sm:$0xf0]  ;;  %v3434_v20 = vld [vmem:[#allocation7 + $0x54] sm:$0xf]  ;;  %v3160_v22 = vld [vmem:[#allocation7 + $0x58] sm:$0xf0] }
  0x23   :  { %281 = vmatpush.bf16.msra.mxu1 %v3179_v10  ;;  %v3159_v21 = vor.u32 %v3435_v19, %v3158_v18  ;;  %v3163_v23 = vor.u32 %v3434_v20, %v3160_v22  ;;  %v3150_v25 = vld [vmem:[#allocation7 + $0x40] sm:$0xf]  ;;  %v3433_v26 = vld [vmem:[#allocation7 + $0x44] sm:$0xf0]  ;;  %v3432_v27 = vld [vmem:[#allocation7 + $0x44] sm:$0xf] }
  0x24   :  { %v3151_v28 = vor.u32 %v3433_v26, %v3150_v25  ;;  %v3152_v29 = vld [vmem:[#allocation7 + $0x48] sm:$0xf0]  ;;  %v3142_v32 = vld [vmem:[#allocation7 + $0x30] sm:$0xf]  ;;  %v3431_v33 = vld [vmem:[#allocation7 + $0x34] sm:$0xf0] }
  0x25   :  { %v3597_v17 = vpop.eup %3596  ;;  %v3155_v30 = vor.u32 %v3432_v27, %v3152_v29  ;;  %v3430_v34 = vld [vmem:[#allocation7 + $0x34] sm:$0xf]  ;;  %v3143_v35 = vor.u32 %v3431_v33, %v3142_v32  ;;  %v3144_v36 = vld [vmem:[#allocation7 + $0x38] sm:$0xf0]  ;;  %v3134_v39 = vld [vmem:[#allocation7 + $0x20] sm:$0xf] }
  0x26   :  { %268 = vmatpush.bf16.msra.mxu0 %v3167_v14  ;;  %v133_v24 = vmul.f32 128.0, %v3597_v17  ;;  %v3147_v37 = vor.u32 %v3430_v34, %v3144_v36  ;;  %v3429_v40 = vld [vmem:[#allocation7 + $0x24] sm:$0xf0]  ;;  %v3428_v41 = vld [vmem:[#allocation7 + $0x24] sm:$0xf]  ;;  %vm137_vm0 = vweird.f32 %v3597_v17  ;;  %s3906_s14 = smov 112  }
  0x27   :  { %282 = vmatpush.bf16.msra.mxu1 %v3171_v16  ;;  %v3135_v42 = vor.u32 %v3429_v40, %v3134_v39  ;;  %v3136_v43 = vld [vmem:[#allocation7 + $0x28] sm:$0xf0]  ;;  %v3126_v46 = vld [vmem:[#allocation7 + $0x10] sm:$0xf]  ;;  %v3427_v47 = vld [vmem:[#allocation7 + $0x14] sm:$0xf0] }
  0x28   :  { %v134_v31 = vsub.f32 1.0, %v133_v24  ;;  %v3139_v44 = vor.u32 %v3428_v41, %v3136_v43  ;;  %v3426_v48 = vld [vmem:[#allocation7 + $0x14] sm:$0xf]  ;;  %v3127_v49 = vor.u32 %v3427_v47, %v3126_v46  ;;  %v3128_v50 = vld [vmem:[#allocation7 + $0x18] sm:$0xf0]  ;;  %s3907_s1 = smov 32  }
  0x29   :  { %130 = vadd.xlane.f32.xlu0 %v127_v3  ;;  %v3118_v51 = vld [vmem:[#allocation7] sm:$0xf]  ;;  %v3425_v52 = vld [vmem:[#allocation7 + $0x4] sm:$0xf0]  ;;  %v3131_v53 = vor.u32 %v3426_v48, %v3128_v50  ;;  %v3424_v54 = vld [vmem:[#allocation7 + $0x4] sm:$0xf] }
  0x2a   :  { %269 = vmatpush.bf16.msra.mxu0 %v3159_v21  ;;  %v135_v38 = vmul.f32 %v3597_v17, %v134_v31  ;;  %v3120_v55 = vld [vmem:[#allocation7 + $0x8] sm:$0xf0]  ;;  %v3119_v57 = vor.u32 %v3425_v52, %v3118_v51  ;;  %s3908_s17 = smov 96   ;;  %s3909_s18 = smov 48   ;;  %v3910_v33 = vmov 1983009808  }
  0x2b   :  { %283 = vmatpush.bf16.msra.mxu1 %v3163_v23  ;;  %v3123_v58 = vor.u32 %v3424_v54, %v3120_v55  ;;  %v389_v34 = vunpack.c.l.s4 %v3910_v33  ;;  %vm384_vm7 = vcmask 1047556   ;;  %v3911_v41 = vmov 1934713408   ;;  %s3095_s25 = sshll.u32 %s5405_s8, 4  ;;  %s3914_s26 = smov [#allocation13]   ;;  %s3096_s25 = int_to_ptr.hbm [resolvable:$true] %s3095_s25 }
  0x2c   :  { %v136_v45 = vadd.f32 %v3597_v17, %v135_v38  ;;  %vm1347_vm8 = vcmask 130048   ;;  %vm2444_vm11 = vcmask 261120   ;;  %vm2447_vm12 = vcmask 392192   ;;  %s3080_s27 = sshll.u32 %s3914_s26, 4  ;;  %s3082_s3 = sshll.u32 %s5404_s7, 4  ;;  %s3081_s27 = int_to_ptr.vmem [resolvable:$true] %s3080_s27  ;;  %s3083_s3 = int_to_ptr.hbm [resolvable:$true] %s3082_s3 }
  0x2d   :  { %v4048_v39 = vunpack.c.0.s8 %v389_v34  ;;  %vm2450_vm13 = vcmask 523264   ;;  %vm2453_vm14 = vcmask 654336   ;;  %vm2456_vm15 = vcmask 785408  }
  0x2e   :  { %270 = vmatpush.bf16.msra.mxu0 %v3151_v28  ;;  %v3999_v56 = vsel %vm137_vm0, %v3597_v17, %v136_v45  ;;  %v3594_v17 = vld [vmem:[#allocation5] ss:$0 sm:$0xff]  ;;  %vm2459_vm0 = vcmask 916480  }
  0x2f   :  { %284 = vmatpush.bf16.msra.mxu1 %v3155_v30 }
  0x32   :  { %271 = vmatpush.bf16.msra.mxu0 %v3143_v35 }
  0x33   :  { %285 = vmatpush.bf16.msra.mxu1 %v3147_v37 }
  0x36   :  { %272 = vmatpush.bf16.msra.mxu0 %v3135_v42  ;;  %v437_v42 = vunpack.c.l.s4 %v3911_v41 }
  0x37   :  { %286 = vmatpush.bf16.msra.mxu1 %v3139_v44 }
  0x3a   :  { %273 = vmatpush.bf16.msra.mxu0 %v3127_v49 }
  0x3b   :  { %287 = vmatpush.bf16.msra.mxu1 %v3131_v53 }
  0x3e   :  { %274 = vmatpush.bf16.msra.mxu0 %v3119_v57 }
  0x3f   :  { %288 = vmatpush.bf16.msra.mxu1 %v3123_v58 }
  0x94   :  { %v129_v59 = vpop.xlane.xlu0 %128 }
  0x95   :  { %v139_v60 = vmul.f32 %v3999_v56, %v129_v59 }
  0x97   :  { %v141_v61 = vadd.f32 1e-06, %v139_v60 }
  0x99   :  { %3598 = vrsqrt.f32 %v141_v61  ;;  %vm149_vm2 = vweird.f32 %v141_v61 }
  0x9c   :  { %v131_v62 = vpop.xlane.xlu0 %130 }
  0x9d   :  { %v140_v63 = vmul.f32 %v3999_v56, %v131_v62 }
  0x9f   :  { %v3599_v1 = vpop.eup %3598  ;;  %v142_v3 = vadd.f32 1e-06, %v140_v63 }
  0xa0   :  { %v144_v4 = vmul.f32 %v3599_v1, %v141_v61  ;;  %vm150_vm1 = vweird.f32 %v3599_v1  ;;  %v4065_v61 = vunpack.c.0.s8 %v437_v42 }
  0xa1   :  { %3600 = vrsqrt.f32 %v142_v3  ;;  %vm151_vm3 = vmor %vm149_vm2, %vm150_vm1  ;;  %vm159_vm5 = vweird.f32 %v142_v3 }
  0xa2   :  { %v145_v5 = vmul.f32 %v3599_v1, %v144_v4 }
  0xa4   :  { %v146_v6 = vmul.f32 0.5, %v145_v5 }
  0xa6   :  { %v147_v7 = vsub.f32 1.5, %v146_v6 }
  0xa7   :  { %v3601_v8 = vpop.eup %3600 }
  0xa8   :  { %v154_v9 = vmul.f32 %v3601_v8, %v142_v3  ;;  %v148_v10 = vmul.f32 %v3599_v1, %v147_v7  ;;  %vm160_vm4 = vweird.f32 %v3601_v8 }
  0xa9   :  { %vm161_vm6 = vmor %vm159_vm5, %vm160_vm4 }
  0xaa   :  { %v155_v11 = vmul.f32 %v3601_v8, %v154_v9  ;;  %v152_v14 = vsel %vm151_vm3, %v3599_v1, %v148_v10 }
  0xab   :  { %v163_v16 = vmul.f32 %v152_v14, %v3991_v0 }
  0xac   :  { %v156_v12 = vmul.f32 0.5, %v155_v11 }
  0xad   :  { %v168_v20 = vmul.f32 %v3594_v17, %v163_v16 }
  0xae   :  { %v157_v13 = vsub.f32 1.5, %v156_v12 }
  0xb0   :  { %v158_v15 = vmul.f32 %v3601_v8, %v157_v13 }
  0xb2   :  { %v162_v18 = vsel %vm161_vm6, %v3601_v8, %v158_v15 }
  0xb3   :  { %v164_v19 = vmul.f32 %v162_v18, %v3995_v2 }
  0xb5   :  { %v169_v21 = vmul.f32 %v3594_v17, %v164_v19 }
  0xb7   :  { %v170_v22 = vpack.c.bf16 %v169_v21, %v168_v20 }
  0xb9   :  { %275 = vmatmul.bf16.vlgmr.msra.gmra.mxu0 %v170_v22  ;;  %289 = vmatmul.bf16.vlgmr.msra.gmra.mxu1 %v170_v22 }
 0x136   :  { %v276_v23 = vpop.f32.mrf.mxu0  ;;  %v4005_v24 = vpop.f32.mrf.mxu1 }
 0x137   :  { %309 = vrot.lane.b32.xlu2 %v276_v23, %s3905_s6  ;;  %315 = vrot.lane.b32.xlu0 %v276_v23, %s3894_s15  ;;  %v386_v37 = vrot.slane %v276_v23, 4  ;;  %v498_v52 = vrot.slane %v4005_v24, 4 }
 0x138   :  { %297 = vrot.lane.b32.xlu1 %v276_v23, %s3906_s14 }
 0x13e   :  { %v4010_v0 = vpop.f32.mrf.mxu1  ;;  %v4020_v25 = vpop.f32.mrf.mxu0 }
 0x13f   :  { %327 = vrot.lane.b32.xlu0 %v276_v23, %s3907_s1  ;;  %v3534_v2 = vpack.i.bf16 %v4010_v0, %v4005_v24  ;;  %v610_v55 = vrot.slane %v4020_v25, 4  ;;  %v722_v57 = vrot.slane %v4010_v0, 4 }
 0x140   :  { %303 = vrot.lane.b32.xlu1 %v276_v23, %s3908_s17 }
 0x141   :  { %3535 = vrot.lane.b32.xlu2 %v3534_v2, %s3894_s15 }
 0x147   :  { %3545 = vrot.lane.b32.xlu0 %v3534_v2, %s3909_s18 }
 0x148   :  { %321 = vrot.lane.b32.xlu1 %v276_v23, %s3909_s18 }
 0x149   :  { %3540 = vrot.lane.b32.xlu2 %v3534_v2, %s3905_s6 }
 0x14f   :  { %311 = vrot.lane.b32.xlu0 %v4020_v25, %s3905_s6 }
 0x150   :  { %3525 = vrot.lane.b32.xlu1 %v3534_v2, %s3906_s14 }
 0x151   :  { %3555 = vrot.lane.b32.xlu2 %v3534_v2, %s3902_s12 }
 0x157   :  { %335 = vrot.lane.b32.xlu0 %v4020_v25, %s3902_s12 }
 0x158   :  { %3530 = vrot.lane.b32.xlu1 %v3534_v2, %s3908_s17 }
 0x159   :  { %299 = vrot.lane.b32.xlu2 %v4020_v25, %s3906_s14 }
 0x160   :  { %3550 = vrot.lane.b32.xlu1 %v3534_v2, %s3907_s1 }
 0x161   :  { %305 = vrot.lane.b32.xlu2 %v4020_v25, %s3908_s17 }
 0x168   :  { %317 = vrot.lane.b32.xlu1 %v4020_v25, %s3894_s15 }
 0x169   :  { %323 = vrot.lane.b32.xlu2 %v4020_v25, %s3909_s18 }
 0x170   :  { %329 = vrot.lane.b32.xlu1 %v4020_v25, %s3907_s1 }
 0x171   :  { %333 = vrot.lane.b32.xlu2 %v276_v23, %s3902_s12 }
 0x191   :  { %v310_v26 = vpop.permute.xlu2 %309 }
 0x192   :  { %v396_v38 = vrot.slane %v310_v26, 4 }
 0x19b   :  { %v4041_v27 = vpop.permute.xlu2 %3535 }
 0x19c   :  { %v3538_v49 = vunpack.i.h.bf16 %v4041_v27  ;;  %v3537_v58 = vunpack.i.l.bf16 %v4041_v27 }
 0x19e   :  { %v4072_v4 = vrot.slane %v3538_v49, 4  ;;  %v4081_v14 = vrot.slane %v3537_v58, 4 }
 0x1a3   :  { %v4043_v28 = vpop.permute.xlu2 %3540 }
 0x1a4   :  { %v3543_v5 = vunpack.i.h.bf16 %v4043_v28  ;;  %v3542_v6 = vunpack.i.l.bf16 %v4043_v28 }
 0x1a9   :  { %v316_v29 = vpop.permute.xlu0 %315 }
 0x1aa   :  { %v298_v30 = vpop.permute.xlu1 %297  ;;  %v410_v53 = vrot.slane %v316_v29, 4 }
 0x1ab   :  { %v4045_v31 = vpop.permute.xlu2 %3555  ;;  %v398_v32 = vrot.slane %v298_v30, 4  ;;  %v397_v46 = vsel %vm384_vm7, %v396_v38, %v298_v30  ;;  %v732_v30 = vrot.slane %v3543_v5, 4 }
 0x1ac   :  { %v403_v59 = vperm.slane %v397_v46, %v4048_v39  ;;  %v3558_v60 = vunpack.i.h.bf16 %v4045_v31  ;;  %v3557_v63 = vunpack.i.l.bf16 %v4045_v31  ;;  %v508_v31 = vrot.slane %v3542_v6, 4 }
 0x1ad   :  { %v399_v35 = vsel %vm384_vm7, %v310_v26, %v398_v32 }
 0x1ae   :  { %v407_v47 = vperm.slane %v399_v35, %v4048_v39  ;;  %v432_v15 = vrot.slane %v403_v59, 4  ;;  %v756_v19 = vrot.slane %v3558_v60, 4  ;;  %v532_v20 = vrot.slane %v3557_v63, 4 }
 0x1b0   :  { %v444_v62 = vrot.slane %v407_v47, 4 }
 0x1b1   :  { %v328_v36 = vpop.permute.xlu0 %327 }
 0x1b2   :  { %v304_v40 = vpop.permute.xlu1 %303  ;;  %v408_v48 = vrot.slane %v328_v36, 4  ;;  %v411_v3 = vsel %vm384_vm7, %v328_v36, %v410_v53 }
 0x1b3   :  { %v383_v43 = vrot.slane %v304_v40, 4  ;;  %v387_v44 = vsel %vm384_vm7, %v304_v40, %v386_v37  ;;  %v4051_v45 = vpop.permute.xlu2 %299  ;;  %v4087_v17 = vperm.slane %v411_v3, %v4048_v39 }
 0x1b4   :  { %v395_v51 = vperm.slane %v387_v44, %v4048_v39  ;;  %v409_v1 = vsel %vm384_vm7, %v408_v48, %v316_v29  ;;  %v622_v33 = vrot.slane %v4051_v45, 4 }
 0x1b5   :  { %v385_v50 = vsel %vm384_vm7, %v383_v43, %v276_v23  ;;  %v4084_v16 = vperm.slane %v409_v1, %v4048_v39  ;;  %v470_v35 = vrot.slane %v4087_v17, 4 }
 0x1b6   :  { %v391_v54 = vperm.slane %v385_v50, %v4048_v39  ;;  %v446_v7 = vrot.slane %v395_v51, 4  ;;  %v445_v10 = vsel %vm384_vm7, %v444_v62, %v395_v51 }
 0x1b7   :  { %v4092_v26 = vperm.slane %v445_v10, %v4065_v61  ;;  %v458_v34 = vrot.slane %v4084_v16, 4 }
 0x1b8   :  { %v434_v9 = vrot.slane %v391_v54, 4  ;;  %v433_v23 = vsel %vm384_vm7, %v432_v15, %v391_v54  ;;  %v447_v2 = vsel %vm384_vm7, %v407_v47, %v446_v7 }
 0x1b9   :  { %v3546_v8 = vpop.permute.xlu0 %3545  ;;  %v4105_v38 = vperm.slane %v433_v23, %v4065_v61  ;;  %v4108_v40 = vperm.slane %v447_v2, %v4065_v61  ;;  %v490_v44 = vrot.slane %v4092_v26, 4 }
 0x1ba   :  { %v3548_v11 = vunpack.i.h.bf16 %v3546_v8  ;;  %v3547_v12 = vunpack.i.l.bf16 %v3546_v8  ;;  %v4077_v13 = vpop.permute.xlu1 %321  ;;  %v435_v32 = vsel %vm384_vm7, %v403_v59, %v434_v9 }
 0x1bb   :  { %v306_v18 = vpop.permute.xlu2 %305  ;;  %v4113_v43 = vperm.slane %v435_v32, %v4065_v61  ;;  %v494_v15 = vrot.slane %v4108_v40, 4 }
 0x1bc   :  { %v758_v21 = vrot.slane %v3548_v11, 4  ;;  %v534_v22 = vrot.slane %v3547_v12, 4  ;;  %v608_v29 = vrot.slane %v306_v18, 4  ;;  %v757_v36 = vsel %vm384_vm7, %v756_v19, %v3548_v11 }
 0x1bd   :  { %v533_v37 = vsel %vm384_vm7, %v532_v20, %v3547_v12  ;;  %v611_v47 = vsel %vm384_vm7, %v306_v18, %v610_v55  ;;  %v4120_v50 = vperm.slane %v757_v36, %v4048_v39  ;;  %v482_v12 = vrot.slane %v4105_v38, 4 }
 0x1be   :  { %v759_v41 = vsel %vm384_vm7, %v3558_v60, %v758_v21  ;;  %v535_v42 = vsel %vm384_vm7, %v3557_v63, %v534_v22  ;;  %v609_v46 = vsel %vm384_vm7, %v608_v29, %v4020_v25  ;;  %v4123_v51 = vperm.slane %v533_v37, %v4048_v39 }
 0x1bf   :  { %v4127_v60 = vperm.slane %v759_v41, %v4048_v39  ;;  %v4130_v62 = vperm.slane %v535_v42, %v4048_v39  ;;  %v615_v55 = vperm.slane %v609_v46, %v4048_v39  ;;  %v619_v1 = vperm.slane %v611_v47, %v4048_v39 }
 0x1c0   :  { %v422_v18 = vrot.slane %v4077_v13, 4  ;;  %v486_v20 = vrot.slane %v4113_v43, 4 }
 0x1c1   :  { %v312_v48 = vpop.permute.xlu0 %311  ;;  %v670_v2 = vrot.slane %v619_v1, 4  ;;  %v804_v32 = vrot.slane %v4127_v60, 4  ;;  %v580_v36 = vrot.slane %v4130_v62, 4  ;;  %v658_v37 = vrot.slane %v615_v55, 4 }
 0x1c2   :  { %v3526_v53 = vpop.permute.xlu1 %3525  ;;  %v620_v54 = vrot.slane %v312_v48, 4  ;;  %v623_v59 = vsel %vm384_vm7, %v312_v48, %v622_v33  ;;  %v568_v33 = vrot.slane %v4123_v51, 4 }
 0x1c3   :  { %v3528_v25 = vunpack.i.h.bf16 %v3526_v53  ;;  %v3527_v63 = vunpack.i.l.bf16 %v3526_v53  ;;  %v631_v7 = vperm.slane %v623_v59, %v4048_v39  ;;  %v324_v23 = vpop.permute.xlu2 %323 }
 0x1c4   :  { %v621_v3 = vsel %vm384_vm7, %v620_v54, %v4051_v45  ;;  %v792_v45 = vrot.slane %v4120_v50, 4  ;;  %v646_v47 = vrot.slane %v324_v23, 4 }
 0x1c5   :  { %v733_v8 = vsel %vm384_vm7, %v732_v30, %v3528_v25  ;;  %v734_v9 = vrot.slane %v3528_v25, 4  ;;  %v509_v10 = vsel %vm384_vm7, %v508_v31, %v3527_v63  ;;  %v510_v11 = vrot.slane %v3527_v63, 4 }
 0x1c6   :  { %v627_v19 = vperm.slane %v621_v3, %v4048_v39  ;;  %v739_v21 = vperm.slane %v733_v8, %v4048_v39  ;;  %v515_v30 = vperm.slane %v509_v10, %v4048_v39  ;;  %v668_v31 = vrot.slane %v631_v7, 4 }
 0x1c7   :  { %v511_v22 = vsel %vm384_vm7, %v3542_v6, %v510_v11  ;;  %v735_v29 = vsel %vm384_vm7, %v3543_v5, %v734_v9  ;;  %v671_v46 = vsel %vm384_vm7, %v631_v7, %v670_v2 }
 0x1c8   :  { %v519_v42 = vperm.slane %v511_v22, %v4048_v39  ;;  %v656_v6 = vrot.slane %v627_v19, 4  ;;  %v743_v5 = vperm.slane %v735_v29, %v4048_v39  ;;  %v768_v48 = vrot.slane %v739_v21, 4 }
 0x1c9   :  { %v336_v41 = vpop.permute.xlu0 %335  ;;  %v544_v59 = vrot.slane %v515_v30, 4  ;;  %v659_v25 = vsel %vm384_vm7, %v627_v19, %v658_v37  ;;  %v669_v63 = vsel %vm384_vm7, %v668_v31, %v619_v1  ;;  %v4171_v1 = vperm.slane %v671_v46, %v4065_v61 }
 0x1ca   :  { %v3531_v28 = vpop.permute.xlu1 %3530  ;;  %v644_v3 = vrot.slane %v336_v41, 4  ;;  %v556_v11 = vrot.slane %v519_v42, 4  ;;  %v657_v22 = vsel %vm384_vm7, %v656_v6, %v615_v55  ;;  %v780_v29 = vrot.slane %v743_v5, 4 }
 0x1cb   :  { %v3533_v53 = vunpack.i.h.bf16 %v3531_v28  ;;  %v3532_v54 = vunpack.i.l.bf16 %v3531_v28  ;;  %v4178_v37 = vperm.slane %v659_v25, %v4065_v61  ;;  %v4184_v28 = vperm.slane %v657_v22, %v4065_v61 }
 0x1cc   :  { %v4187_v46 = vperm.slane %v669_v63, %v4065_v61 }
 0x1cd   :  { %v720_v8 = vrot.slane %v3533_v53, 4  ;;  %v723_v9 = vsel %vm384_vm7, %v3533_v53, %v722_v57  ;;  %v496_v10 = vrot.slane %v3532_v54, 4  ;;  %v499_v7 = vsel %vm384_vm7, %v3532_v54, %v498_v52 }
 0x1ce   :  { %v731_v2 = vperm.slane %v723_v9, %v4048_v39  ;;  %v507_v19 = vperm.slane %v499_v7, %v4048_v39 }
 0x1cf   :  { %v721_v31 = vsel %vm384_vm7, %v720_v8, %v4010_v0  ;;  %v497_v57 = vsel %vm384_vm7, %v496_v10, %v4005_v24  ;;  %v645_v0 = vsel %vm384_vm7, %v644_v3, %v324_v23  ;;  %v647_v3 = vsel %vm384_vm7, %v336_v41, %v646_v47 }
 0x1d0   :  { %v727_v52 = vperm.slane %v721_v31, %v4048_v39  ;;  %v503_v55 = vperm.slane %v497_v57, %v4048_v39  ;;  %v557_v6 = vsel %vm384_vm7, %v556_v11, %v507_v19  ;;  %v558_v53 = vrot.slane %v507_v19, 4  ;;  %v334_v57 = vpop.permute.xlu2 %333 }
 0x1d1   :  { %v782_v24 = vrot.slane %v731_v2, 4  ;;  %v4196_v7 = vperm.slane %v557_v6, %v4065_v61  ;;  %v4215_v41 = vperm.slane %v645_v0, %v4048_v39 }
 0x1d2   :  { %v770_v54 = vrot.slane %v727_v52, 4  ;;  %v545_v25 = vsel %vm384_vm7, %v544_v59, %v503_v55  ;;  %v546_v8 = vrot.slane %v503_v55, 4  ;;  %v559_v10 = vsel %vm384_vm7, %v519_v42, %v558_v53  ;;  %v3551_v55 = vpop.permute.xlu1 %3550 }
 0x1d3   :  { %v4192_v9 = vperm.slane %v545_v25, %v4065_v61  ;;  %v769_v11 = vsel %vm384_vm7, %v768_v48, %v727_v52  ;;  %v4206_v31 = vperm.slane %v559_v10, %v4065_v61  ;;  %v781_v52 = vsel %vm384_vm7, %v780_v29, %v731_v2 }
 0x1d4   :  { %v547_v23 = vsel %vm384_vm7, %v515_v30, %v546_v8  ;;  %v771_v42 = vsel %vm384_vm7, %v739_v21, %v770_v54  ;;  %v4210_v48 = vperm.slane %v769_v11, %v4065_v61  ;;  %v783_v30 = vsel %vm384_vm7, %v743_v5, %v782_v24 }
 0x1d5   :  { %v4218_v47 = vperm.slane %v547_v23, %v4065_v61  ;;  %v594_v6 = vrot.slane %v4192_v9, 4  ;;  %v602_v53 = vrot.slane %v4196_v7, 4  ;;  %v4223_v21 = vperm.slane %v647_v3, %v4048_v39 }
 0x1d6   :  { %v4226_v54 = vperm.slane %v771_v42, %v4065_v61  ;;  %v420_v25 = vrot.slane %v334_v57, 4  ;;  %v423_v5 = vsel %vm384_vm7, %v334_v57, %v422_v18  ;;  %v3553_v2 = vunpack.i.h.bf16 %v3551_v55 }
 0x1d7   :  { %v606_v29 = vrot.slane %v4206_v31, 4  ;;  %v4233_v0 = vperm.slane %v781_v52, %v4065_v61  ;;  %v4236_v24 = vperm.slane %v783_v30, %v4065_v61  ;;  %v431_v8 = vperm.slane %v423_v5, %v4048_v39 }
 0x1d8   :  { %v818_v10 = vrot.slane %v4210_v48, 4  ;;  %v680_v11 = vrot.slane %v4215_v41, 4  ;;  %v421_v23 = vsel %vm384_vm7, %v420_v25, %v4077_v13  ;;  %v744_v3 = vrot.slane %v3553_v2, 4 }
 0x1d9   :  { %v598_v18 = vrot.slane %v4218_v47, 4  ;;  %v427_v42 = vperm.slane %v421_v23, %v4048_v39  ;;  %v468_v57 = vrot.slane %v431_v8, 4  ;;  %v471_v52 = vsel %vm384_vm7, %v431_v8, %v470_v35 }
 0x1da   :  { %v822_v30 = vrot.slane %v4226_v54, 4  ;;  %v479_v5 = vperm.slane %v471_v52, %v4065_v61  ;;  %v745_v22 = vsel %vm384_vm7, %v744_v3, %v3538_v49  ;;  %v747_v13 = vsel %vm384_vm7, %v3553_v2, %v4072_v4 }
 0x1db   :  { %v456_v25 = vrot.slane %v427_v42, 4  ;;  %v459_v23 = vsel %vm384_vm7, %v427_v42, %v458_v34  ;;  %v469_v19 = vsel %vm384_vm7, %v468_v57, %v4087_v17  ;;  %v751_v35 = vperm.slane %v745_v22, %v4048_v39 }
 0x1dc   :  { %v467_v8 = vperm.slane %v459_v23, %v4065_v61  ;;  %v475_v52 = vperm.slane %v469_v19, %v4065_v61  ;;  %v492_v63 = vrot.slane %v479_v5, 4  ;;  %v495_v49 = vsel %vm384_vm7, %v479_v5, %v494_v15 }
 0x1dd   :  { %v826_v4 = vrot.slane %v4233_v0, 4  ;;  %v457_v34 = vsel %vm384_vm7, %v456_v25, %v4084_v16  ;;  %v3552_v3 = vunpack.i.l.bf16 %v3551_v55  ;;  %v755_v42 = vperm.slane %v747_v13, %v4048_v39 }
 0x1de   :  { %v4271_v17 = vperm.slane %v457_v34, %v4065_v61  ;;  %v488_v22 = vrot.slane %v475_v52, 4  ;;  %v794_v19 = vrot.slane %v751_v35, 4  ;;  %v484_v57 = vrot.slane %v467_v8, 4 }
 0x1df   :  { %v491_v15 = vsel %vm384_vm7, %v475_v52, %v490_v44  ;;  %v493_v5 = vsel %vm384_vm7, %v492_v63, %v4108_v40  ;;  %v868_v23 = vrot.slane %v495_v49, 4  ;;  %v4288_v55 = vsel %vm384_vm7, %v467_v8, %v486_v20 }
 0x1e0   :  { %v4283_v16 = vsel %vm384_vm7, %v4271_v17, %v482_v12  ;;  %v489_v13 = vsel %vm384_vm7, %v488_v22, %v4092_v26  ;;  %v793_v44 = vsel %vm384_vm7, %v792_v45, %v751_v35  ;;  %v830_v40 = vrot.slane %v4236_v24, 4 }
 0x1e1   :  { %v846_v63 = vrot.slane %v4283_v16, 4  ;;  %v858_v25 = vrot.slane %v489_v13, 4  ;;  %v520_v52 = vrot.slane %v3552_v3, 4  ;;  %v856_v12 = vrot.slane %v493_v5, 4 }
 0x1e2   :  { %v870_v34 = vrot.slane %v491_v15, 4  ;;  %v795_v59 = vsel %vm384_vm7, %v4120_v50, %v794_v19  ;;  %v523_v20 = vsel %vm384_vm7, %v3552_v3, %v4081_v14  ;;  %v4303_v26 = vsel %vm384_vm7, %v484_v57, %v4113_v43  ;;  %v318_v3 = vpop.permute.xlu1 %317 }
 0x1e3   :  { %v859_v35 = vsel %vm384_vm7, %v493_v5, %v858_v25  ;;  %v799_v8 = vperm.slane %v793_v44, %v4065_v61  ;;  %v480_v22 = vrot.slane %v4271_v17, 4  ;;  %v869_v50 = vsel %vm384_vm7, %v868_v23, %v491_v15 }
 0x1e4   :  { %v4310_v2 = vperm.slane %v859_v35, %v4048_v39  ;;  %v805_v14 = vsel %vm384_vm7, %v804_v32, %v755_v42  ;;  %v847_v43 = vsel %vm384_vm7, %v4288_v55, %v846_v63  ;;  %v871_v19 = vsel %vm384_vm7, %v495_v49, %v870_v34 }
 0x1e5   :  { %v4320_v57 = vperm.slane %v795_v59, %v4065_v61  ;;  %v806_v5 = vrot.slane %v755_v42, 4  ;;  %v832_v44 = vrot.slane %v4303_v26, 4  ;;  %v4324_v25 = vsel %vm384_vm7, %v856_v12, %v489_v13 }
 0x1e6   :  { %v811_v15 = vperm.slane %v805_v14, %v4065_v61  ;;  %v521_v32 = vsel %vm384_vm7, %v520_v52, %v3537_v58  ;;  %v4331_v23 = vperm.slane %v869_v50, %v4048_v39  ;;  %v816_v59 = vrot.slane %v799_v8, 4 }
 0x1e7   :  { %v807_v49 = vsel %vm384_vm7, %v4127_v60, %v806_v5  ;;  %v527_v42 = vperm.slane %v521_v32, %v4048_v39  ;;  %v4337_v63 = vperm.slane %v847_v43, %v4048_v39  ;;  %v4340_v13 = vperm.slane %v871_v19, %v4048_v39 }
 0x1e8   :  { %v531_v27 = vperm.slane %v523_v20, %v4048_v39  ;;  %v815_v58 = vperm.slane %v807_v49, %v4065_v61  ;;  %v820_v52 = vrot.slane %v4320_v57, 4  ;;  %v824_v35 = vrot.slane %v811_v15, 4 }
 0x1e9   :  { %v569_v60 = vsel %vm384_vm7, %v568_v33, %v527_v42  ;;  %v570_v34 = vrot.slane %v527_v42, 4  ;;  %v4358_v5 = vsel %vm384_vm7, %v816_v59, %v4210_v48  ;;  %v4363_v33 = vsel %vm384_vm7, %v799_v8, %v818_v10 }
 0x1ea   :  { %v575_v50 = vperm.slane %v569_v60, %v4065_v61  ;;  %v581_v14 = vsel %vm384_vm7, %v580_v36, %v531_v27  ;;  %v582_v43 = vrot.slane %v531_v27, 4  ;;  %v828_v42 = vrot.slane %v815_v58, 4 }
 0x1eb   :  { %v571_v20 = vsel %vm384_vm7, %v4123_v51, %v570_v34  ;;  %v587_v19 = vperm.slane %v581_v14, %v4065_v61  ;;  %v4372_v51 = vsel %vm384_vm7, %v4320_v57, %v822_v30  ;;  %v4387_v8 = vsel %vm384_vm7, %v824_v35, %v4233_v0 }
 0x1ec   :  { %v579_v32 = vperm.slane %v571_v20, %v4065_v61  ;;  %v583_v36 = vsel %vm384_vm7, %v4130_v62, %v582_v43  ;;  %v592_v49 = vrot.slane %v575_v50, 4  ;;  %v4378_v48 = vsel %vm384_vm7, %v575_v50, %v594_v6  ;;  %v330_v6 = vpop.permute.xlu1 %329 }
 0x1ed   :  { %v591_v59 = vperm.slane %v583_v36, %v4065_v61  ;;  %v600_v10 = vrot.slane %v587_v19, 4  ;;  %v4392_v30 = vsel %vm384_vm7, %v811_v15, %v826_v4  ;;  %v4395_v57 = vsel %vm384_vm7, %v815_v58, %v830_v40 }
 0x1ee   :  { %v4383_v62 = vsel %vm384_vm7, %v579_v32, %v598_v18  ;;  %v4399_v27 = vsel %vm384_vm7, %v592_v49, %v4192_v9  ;;  %v596_v60 = vrot.slane %v579_v32, 4  ;;  %v603_v18 = vsel %vm384_vm7, %v587_v19, %v602_v53 }
 0x1ef   :  { %v607_v0 = vsel %vm384_vm7, %v591_v59, %v606_v29  ;;  %v4409_v4 = vsel %vm384_vm7, %v600_v10, %v4196_v7  ;;  %v604_v40 = vrot.slane %v591_v59, 4  ;;  %v1070_v15 = vrot.slane %v4378_v48, 4 }
 0x1f0   :  { %v1092_v58 = vrot.slane %v607_v0, 4  ;;  %v1068_v9 = vrot.slane %v4383_v62, 4  ;;  %v1204_v34 = vrot.slane %v4395_v57, 4  ;;  %v634_v35 = vrot.slane %v318_v3, 4 }
 0x1f1   :  { %v632_v50 = vrot.slane %v330_v6, 4  ;;  %v1094_v14 = vrot.slane %v603_v18, 4  ;;  %v1180_v53 = vrot.slane %v4372_v51, 4  ;;  %v1182_v43 = vrot.slane %v4363_v33, 4 }
 0x1f2   :  { %v1206_v29 = vrot.slane %v4392_v30, 4  ;;  %v4418_v7 = vsel %vm384_vm7, %v1092_v58, %v603_v18  ;;  %v635_v19 = vsel %vm384_vm7, %v330_v6, %v634_v35  ;;  %v4424_v32 = vsel %vm384_vm7, %v596_v60, %v4218_v47 }
 0x1f3   :  { %v633_v20 = vsel %vm384_vm7, %v632_v50, %v318_v3  ;;  %v643_v49 = vperm.slane %v635_v19, %v4048_v39  ;;  %v4430_v59 = vsel %vm384_vm7, %v604_v40, %v4206_v31  ;;  %v4434_v10 = vsel %vm384_vm7, %v820_v52, %v4226_v54 }
 0x1f4   :  { %v639_v36 = vperm.slane %v633_v20, %v4048_v39  ;;  %v4438_v3 = vsel %vm384_vm7, %v1204_v34, %v4392_v30  ;;  %v4442_v47 = vsel %vm384_vm7, %v828_v42, %v4236_v24  ;;  %v1058_v6 = vrot.slane %v4399_v27, 4 }
 0x1f5   :  { %v1082_v60 = vrot.slane %v4409_v4, 4  ;;  %v5406_v54 = vrot.slane %v4223_v21, 4  ;;  %v694_v40 = vrot.slane %v643_v49, 4  ;;  %v1056_v24 = vrot.slane %v4424_v32, 4 }
 0x1f6   :  { %v681_v31 = vsel %vm384_vm7, %v680_v11, %v639_v36  ;;  %v682_v18 = vrot.slane %v639_v36, 4  ;;  %v1071_v42 = vsel %vm384_vm7, %v4383_v62, %v1070_v15  ;;  %v1080_v50 = vrot.slane %v4430_v59, 4 }
 0x1f7   :  { %v693_v52 = vsel %vm384_vm7, %v5406_v54, %v643_v49  ;;  %v687_v58 = vperm.slane %v681_v31, %v4065_v61  ;;  %v695_v11 = vsel %vm384_vm7, %v4223_v21, %v694_v40  ;;  %v1095_v20 = vsel %vm384_vm7, %v607_v0, %v1094_v14 }
 0x1f8   :  { %v699_v34 = vperm.slane %v693_v52, %v4065_v61  ;;  %v683_v35 = vsel %vm384_vm7, %v4215_v41, %v682_v18  ;;  %v703_v36 = vperm.slane %v695_v11, %v4065_v61  ;;  %v5407_v31 = vrot.slane %v4184_v28, 4 }
 0x1f9   :  { %v691_v19 = vperm.slane %v683_v35, %v4065_v61  ;;  %v704_v49 = vrot.slane %v687_v58, 4  ;;  %v1059_v41 = vsel %vm384_vm7, %v4424_v32, %v1058_v6  ;;  %v4471_v18 = vperm.slane %v1071_v42, %v4048_v39 }
 0x1fa   :  { %v707_v54 = vsel %vm384_vm7, %v687_v58, %v5407_v31  ;;  %v712_v15 = vrot.slane %v699_v34, 4  ;;  %v1083_v21 = vsel %vm384_vm7, %v4430_v59, %v1082_v60  ;;  %v5408_v52 = vrot.slane %v4178_v37, 4 }
 0x1fb   :  { %v4477_v0 = vsel %vm384_vm7, %v704_v49, %v4184_v28  ;;  %v708_v14 = vrot.slane %v691_v19, 4  ;;  %v716_v58 = vrot.slane %v703_v36, 4  ;;  %v5409_v6 = vrot.slane %v4187_v46, 4 }
 0x1fc   :  { %v711_v40 = vsel %vm384_vm7, %v691_v19, %v5408_v52  ;;  %v713_v35 = vsel %vm384_vm7, %v712_v15, %v4187_v46  ;;  %v5410_v11 = vrot.slane %v4171_v1, 4  ;;  %v958_v31 = vrot.slane %v707_v54, 4 }
 0x1fd   :  { %v715_v42 = vsel %vm384_vm7, %v699_v34, %v5409_v6  ;;  %v717_v28 = vsel %vm384_vm7, %v716_v58, %v4171_v1  ;;  %v970_v49 = vrot.slane %v713_v35, 4  ;;  %v4493_v12 = vperm.slane %v1059_v41, %v4048_v39 }
 0x1fe   :  { %v719_v60 = vsel %vm384_vm7, %v703_v36, %v5410_v11  ;;  %v4496_v19 = vperm.slane %v1083_v21, %v4048_v39  ;;  %v4500_v46 = vsel %vm384_vm7, %v708_v14, %v4178_v37  ;;  %v946_v34 = vrot.slane %v4477_v0, 4 }
 0x1ff   :  { %v956_v15 = vrot.slane %v711_v40, 4  ;;  %v968_v52 = vrot.slane %v717_v28, 4  ;;  %v971_v36 = vsel %vm384_vm7, %v717_v28, %v970_v49  ;;  %v980_v6 = vrot.slane %v719_v60, 4 }
 0x200   :  { %v982_v11 = vrot.slane %v715_v42, 4  ;;  %v4505_v1 = vperm.slane %v1095_v20, %v4048_v39  ;;  %v4508_v41 = vsel %vm384_vm7, %v711_v40, %v958_v31  ;;  %v4512_v58 = vperm.slane %v971_v36, %v4048_v39 }
 0x201   :  { %v969_v21 = vsel %vm384_vm7, %v968_v52, %v713_v35  ;;  %v1116_v37 = vrot.slane %v4471_v18, 4  ;;  %v981_v28 = vsel %vm384_vm7, %v980_v6, %v715_v42  ;;  %v944_v45 = vrot.slane %v4500_v46, 4 }
 0x202   :  { %v4516_v14 = vperm.slane %v969_v21, %v4048_v39  ;;  %v983_v49 = vsel %vm384_vm7, %v719_v60, %v982_v11  ;;  %v1140_v20 = vrot.slane %v4505_v1, 4  ;;  %v4524_v40 = vsel %vm384_vm7, %v4500_v46, %v946_v34 }
 0x203   :  { %v4527_v35 = vperm.slane %v981_v28, %v4048_v39  ;;  %v1117_v31 = vsel %vm384_vm7, %v1116_v37, %v4493_v12  ;;  %v4532_v52 = vsel %vm384_vm7, %v956_v15, %v707_v54  ;;  %v1118_v42 = vrot.slane %v4493_v12, 4 }
 0x204   :  { %v4536_v60 = vperm.slane %v1117_v31, %v4065_v61  ;;  %v1141_v36 = vsel %vm384_vm7, %v1140_v20, %v4496_v19  ;;  %v4541_v34 = vperm.slane %v983_v49, %v4048_v39  ;;  %v1142_v21 = vrot.slane %v4496_v19, 4 }
 0x205   :  { %v4547_v54 = vperm.slane %v1141_v36, %v4065_v61  ;;  %v1170_v15 = vrot.slane %v4358_v5, 4  ;;  %v1183_v37 = vsel %vm384_vm7, %v4372_v51, %v1182_v43  ;;  %v1194_v20 = vrot.slane %v4387_v8, 4 }
 0x206   :  { %v1162_v12 = vrot.slane %v4536_v60, 4  ;;  %v1191_v49 = vperm.slane %v1183_v37, %v4048_v39  ;;  %v1207_v19 = vsel %vm384_vm7, %v4395_v57, %v1206_v29  ;;  %v1057_v43 = vsel %vm384_vm7, %v1056_v24, %v4399_v27 }
 0x207   :  { %v1171_v36 = vsel %vm384_vm7, %v4434_v10, %v1170_v15  ;;  %v1215_v6 = vperm.slane %v1207_v19, %v4048_v39  ;;  %v1168_v37 = vrot.slane %v4434_v10, 4  ;;  %v1195_v57 = vsel %vm384_vm7, %v4442_v47, %v1194_v20 }
 0x208   :  { %v1163_v31 = vsel %vm384_vm7, %v4547_v54, %v1162_v12  ;;  %v1179_v30 = vperm.slane %v1171_v36, %v4048_v39  ;;  %v1228_v29 = vrot.slane %v1191_v49, 4  ;;  %v1192_v12 = vrot.slane %v4442_v47, 4 }
 0x209   :  { %v1203_v11 = vperm.slane %v1195_v57, %v4048_v39  ;;  %v1252_v15 = vrot.slane %v1215_v6, 4  ;;  %v1069_v32 = vsel %vm384_vm7, %v1068_v9, %v4378_v48  ;;  %v1322_v24 = vpack.c.bf16 %v1163_v31, %v1163_v31 }
 0x20a   :  { %v1229_v27 = vsel %vm384_vm7, %v1228_v29, %v1179_v30  ;;  %v4583_v10 = vperm.slane %v1057_v43, %v4048_v39  ;;  %v4586_v19 = vperm.slane %v1069_v32, %v4048_v39  ;;  %v1230_v20 = vrot.slane %v1179_v30, 4 }
 0x20b   :  { %v4589_v47 = vperm.slane %v1229_v27, %v4065_v61  ;;  %v1253_v36 = vsel %vm384_vm7, %v1252_v15, %v1203_v11  ;;  %v1081_v48 = vsel %vm384_vm7, %v1080_v50, %v4409_v4  ;;  %v4604_v31 = vperm.slane %v4418_v7, %v4048_v39 }
 0x20c   :  { %v4597_v62 = vperm.slane %v1253_v36, %v4065_v61  ;;  %v4600_v9 = vperm.slane %v1081_v48, %v4048_v39  ;;  %v1104_v43 = vrot.slane %v4586_v19, 4  ;;  %v1169_v57 = vsel %vm384_vm7, %v1168_v37, %v4358_v5 }
 0x20d   :  { %v1274_v30 = vrot.slane %v4589_v47, 4  ;;  %v1181_v4 = vsel %vm384_vm7, %v1180_v53, %v4363_v33  ;;  %v1193_v59 = vsel %vm384_vm7, %v1192_v12, %v4387_v8  ;;  %v1254_v50 = vrot.slane %v1203_v11, 4 }
 0x20e   :  { %v1795_v29 = vunpack.c.l.b16 %v1322_v24  ;;  %v1105_v7 = vsel %vm384_vm7, %v1104_v43, %v4583_v10  ;;  %v1128_v15 = vrot.slane %v4604_v31, 4  ;;  %v1175_v37 = vperm.slane %v1169_v57, %v4048_v39 }
 0x20f   :  { %v1275_v32 = vsel %vm384_vm7, %v4597_v62, %v1274_v30  ;;  %v1111_v5 = vperm.slane %v1105_v7, %v4065_v61  ;;  %v1187_v51 = vperm.slane %v1181_v4, %v4048_v39  ;;  %v4627_v53 = vperm.slane %v1193_v59, %v4048_v39 }
 0x210   :  { %v1323_v33 = vpack.c.bf16 %v1275_v32, %v1275_v32  ;;  %v1129_v8 = vsel %vm384_vm7, %v1128_v15, %v4600_v9  ;;  %v1211_v11 = vperm.slane %v4438_v3, %v4048_v39  ;;  %v1119_v24 = vsel %vm384_vm7, %v4471_v18, %v1118_v42 }
 0x211   :  { %v1135_v12 = vperm.slane %v1129_v8, %v4065_v61  ;;  %v1216_v27 = vrot.slane %v1187_v51, 4  ;;  %v1143_v36 = vsel %vm384_vm7, %v4505_v1, %v1142_v21  ;;  %v4637_v30 = vperm.slane %v1119_v24, %v4065_v61 }
 0x212   :  { %v1796_v48 = vunpack.c.l.b16 %v1323_v33  ;;  %v1240_v43 = vrot.slane %v1211_v11, 4  ;;  %v4640_v57 = vperm.slane %v1143_v36, %v4065_v61  ;;  %v1231_v59 = vsel %vm384_vm7, %v1191_v49, %v1230_v20 }
 0x213   :  { %v1152_v4 = vrot.slane %v1135_v12, 4  ;;  %v1217_v3 = vsel %vm384_vm7, %v1216_v27, %v1175_v37  ;;  %v1255_v7 = vsel %vm384_vm7, %v1215_v6, %v1254_v50  ;;  %v1166_v42 = vrot.slane %v4637_v30, 4 }
 0x214   :  { %v4645_v15 = vpack.c.b16 %v1796_v48, %v1795_v29  ;;  %v1223_v18 = vperm.slane %v1217_v3, %v4065_v61  ;;  %v1241_v1 = vsel %vm384_vm7, %v1240_v43, %v4627_v53  ;;  %v4654_v33 = vperm.slane %v1231_v59, %v4065_v61 }
 0x215   :  { %v1153_v21 = vsel %vm384_vm7, %v1152_v4, %v1111_v5  ;;  %v1247_v32 = vperm.slane %v1241_v1, %v4065_v61  ;;  %v4657_v49 = vperm.slane %v1255_v7, %v4065_v61  ;;  %v1167_v20 = vsel %vm384_vm7, %v4640_v57, %v1166_v42 }
 0x216   :  { %1809 = vmatpush.bf16.msrb.mxu0 %v4645_v15  ;;  %v1312_v6 = vpack.c.bf16 %v1153_v21, %v1153_v21  ;;  %v1154_v50 = vrot.slane %v1111_v5, 4  ;;  %v1266_v29 = vrot.slane %v1223_v18, 4  ;;  %v1278_v27 = vrot.slane %v4654_v33, 4 }
 0x217   :  { %v1264_v8 = vrot.slane %v1247_v32, 4  ;;  %v1326_v24 = vpack.c.bf16 %v1167_v20, %v1167_v20  ;;  %v1106_v36 = vrot.slane %v4583_v10, 4  ;;  %v1130_v3 = vrot.slane %v4600_v9, 4 }
 0x218   :  { %v1344_v48 = vunpack.c.l.b16 %v1312_v6  ;;  %v1155_v43 = vsel %vm384_vm7, %v1135_v12, %v1154_v50  ;;  %v1267_v4 = vsel %vm384_vm7, %v1247_v32, %v1266_v29  ;;  %v1279_v7 = vsel %vm384_vm7, %v4657_v49, %v1278_v27 }
 0x219   :  { %v1265_v59 = vsel %vm384_vm7, %v1264_v8, %v1223_v18  ;;  %v1895_v5 = vunpack.c.l.b16 %v1326_v24  ;;  %v1314_v1 = vpack.c.bf16 %v1155_v43, %v1155_v43  ;;  %v1327_v21 = vpack.c.bf16 %v1279_v7, %v1279_v7 }
 0x21a   :  { %v1313_v42 = vpack.c.bf16 %v1265_v59, %v1265_v59  ;;  %v1315_v28 = vpack.c.bf16 %v1267_v4, %v1267_v4  ;;  %v1107_v10 = vsel %vm384_vm7, %v4586_v19, %v1106_v36  ;;  %v1131_v32 = vsel %vm384_vm7, %v4604_v31, %v1130_v3 }
 0x21b   :  { %v1397_v6 = vunpack.c.l.b16 %v1314_v1  ;;  %v1115_v12 = vperm.slane %v1107_v10, %v4065_v61  ;;  %v1218_v9 = vrot.slane %v1175_v37, 4  ;;  %v1896_v18 = vunpack.c.l.b16 %v1327_v21 }
 0x21c   :  { %v1345_v20 = vunpack.c.l.b16 %v1313_v42  ;;  %v1398_v50 = vunpack.c.l.b16 %v1315_v28  ;;  %v1139_v29 = vperm.slane %v1131_v32, %v4065_v61  ;;  %v1242_v24 = vrot.slane %v4627_v53, 4 }
 0x21d   :  { %v1158_v8 = vrot.slane %v1115_v12, 4  ;;  %v1219_v27 = vsel %vm384_vm7, %v1187_v51, %v1218_v9  ;;  %v481_v19 = vsel %vm384_vm7, %v480_v22, %v4105_v38  ;;  %v1160_v36 = vrot.slane %v4547_v54, 4 }
 0x21e   :  { %v1346_v43 = vpack.c.b16 %v1345_v20, %v1344_v48  ;;  %v4683_v31 = vpack.c.b16 %v1896_v18, %v1895_v5  ;;  %v1399_v37 = vpack.c.b16 %v1398_v50, %v1397_v6  ;;  %v1227_v4 = vperm.slane %v1219_v27, %v4065_v61 }
 0x21f   :  { %v1159_v28 = vsel %vm384_vm7, %v1139_v29, %v1158_v8  ;;  %v1243_v3 = vsel %vm384_vm7, %v1211_v11, %v1242_v24  ;;  %v833_v51 = vsel %vm384_vm7, %v832_v44, %v481_v19  ;;  %v1272_v48 = vrot.slane %v4597_v62, 4 }
 0x220   :  { %v1352_v17 = vsel %vm1347_vm8, %v1346_v43, 0  ;;  %1909 = vmatpush.bf16.msra.mxu0 %v4683_v31  ;;  %v1404_v38 = vsel %vm1347_vm8, %v1399_v37, 0  ;;  %v1251_v22 = vperm.slane %v1243_v3, %v4065_v61  ;;  %v1318_v53 = vpack.c.bf16 %v1159_v28, %v1159_v28 }
 0x221   :  { %1361 = vmatpush.bf16.xpose.msra.mxu2 %v1352_v17  ;;  %1383 = vmatpush.bf16.xpose.msra.mxu3 %v1352_v17  ;;  %v1156_v59 = vrot.slane %v1139_v29, 4  ;;  %v1270_v7 = vrot.slane %v1227_v4, 4  ;;  %v5411_v11 = vrot.slane %v4288_v55, 4  ;;  %v834_v5 = vrot.slane %v481_v19, 4 }
 0x222   :  { %v4701_v1 = vperm.slane %v833_v51, %v4048_v39  ;;  %v4708_v21 = vperm.slane %v4324_v25, %v4048_v39  ;;  %v1268_v10 = vrot.slane %v1251_v22, 4  ;;  %v904_v55 = vrot.slane %v4331_v23, 4 }
 0x223   :  { %v845_v44 = vsel %vm384_vm7, %v5411_v11, %v4283_v16  ;;  %v1271_v6 = vsel %vm384_vm7, %v1251_v22, %v1270_v7  ;;  %v945_v16 = vsel %vm384_vm7, %v944_v45, %v4477_v0  ;;  %v1501_v9 = vunpack.c.l.b16 %v1318_v53 }
 0x224   :  { %v4704_v42 = vperm.slane %v845_v44, %v4048_v39  ;;  %v1319_v32 = vpack.c.bf16 %v1271_v6, %v1271_v6  ;;  %v4718_v18 = vperm.slane %v945_v16, %v4048_v39  ;;  %v905_v25 = vsel %vm384_vm7, %v904_v55, %v4708_v21 }
 0x225   :  { %v4724_v50 = vperm.slane %v4532_v52, %v4048_v39  ;;  %v5412_v29 = vrot.slane %v4527_v35, 4  ;;  %v1157_v45 = vsel %vm384_vm7, %v1156_v59, %v1115_v12  ;;  %v882_v27 = vrot.slane %v4701_v1, 4 }
 0x226   :  { %v880_v20 = vrot.slane %v4704_v42, 4  ;;  %v1502_v0 = vunpack.c.l.b16 %v1319_v32  ;;  %v911_v24 = vperm.slane %v905_v25, %v4065_v61  ;;  %v1269_v37 = vsel %vm384_vm7, %v1268_v10, %v1227_v4 }
 0x227   :  { %v1017_v46 = vsel %vm384_vm7, %v5412_v29, %v4516_v14  ;;  %v992_v52 = vrot.slane %v4724_v50, 4  ;;  %v1316_v51 = vpack.c.bf16 %v1157_v45, %v1157_v45  ;;  %v1317_v12 = vpack.c.bf16 %v1269_v37, %v1269_v37 }
 0x228   :  { %v881_v8 = vsel %vm384_vm7, %v880_v20, %v4701_v1  ;;  %v1023_v43 = vperm.slane %v1017_v46, %v4065_v61  ;;  %v1503_v28 = vpack.c.b16 %v1502_v0, %v1501_v9  ;;  %v928_v3 = vrot.slane %v911_v24, 4 }
 0x229   :  { %1413 = vmatpush.bf16.xpose.msrb.mxu2 %v1404_v38  ;;  %1435 = vmatpush.bf16.xpose.msrb.mxu3 %v1404_v38  ;;  %v887_v19 = vperm.slane %v881_v8, %v4065_v61  ;;  %v993_v17 = vsel %vm384_vm7, %v992_v52, %v4718_v18  ;;  %v835_v22 = vsel %vm384_vm7, %v4303_v26, %v834_v5  ;;  %v5413_v53 = vrot.slane %v4310_v2, 4 }
 0x22a   :  { %v1040_v38 = vrot.slane %v1023_v43, 4  ;;  %v1508_v7 = vsel %vm1347_vm8, %v1503_v28, 0  ;;  %v999_v11 = vperm.slane %v993_v17, %v4065_v61  ;;  %v1449_v44 = vunpack.c.l.b16 %v1316_v51 }
 0x22b   :  { %v919_v59 = vsel %vm384_vm7, %v4340_v13, %v5413_v53  ;;  %v929_v4 = vsel %vm384_vm7, %v928_v3, %v887_v19  ;;  %1517 = vmatpush.bf16.xpose.msrb.mxu1 %v1508_v7  ;;  %v1450_v10 = vunpack.c.l.b16 %v1317_v12  ;;  %v4751_v6 = vperm.slane %v835_v22, %v4048_v39 }
 0x22c   :  { %v1280_v1 = vmul.f32 0.25, %v929_v4  ;;  %v4754_v26 = vperm.slane %v919_v59, %v4065_v61  ;;  %v906_v5 = vrot.slane %v4708_v21, 4  ;;  %v1041_v55 = vsel %vm384_vm7, %v1040_v38, %v999_v11 }
 0x22d   :  { %v4760_v16 = vperm.slane %v4524_v40, %v4048_v39  ;;  %v5414_v32 = vrot.slane %v4512_v58, 4  ;;  %v1281_v20 = vmul.f32 0.25, %v1041_v55  ;;  %v894_v29 = vrot.slane %v4751_v6, 4 }
 0x22e   :  { %v1296_v25 = vpack.c.bf16 %v1280_v1, %v1280_v1  ;;  %v4769_v46 = vperm.slane %v4508_v41, %v4048_v39  ;;  %v1451_v21 = vpack.c.b16 %v1450_v10, %v1449_v44  ;;  %v940_v45 = vrot.slane %v4754_v26, 4 }
 0x22f   :  { %v1031_v9 = vsel %vm384_vm7, %v4541_v34, %v5414_v32  ;;  %v1006_v0 = vrot.slane %v4760_v16, 4  ;;  %v994_v8 = vrot.slane %v4718_v18, 4  ;;  %v1297_v52 = vpack.c.bf16 %v1281_v20, %v1281_v20 }
 0x230   :  { %v1039_v40 = vperm.slane %v1031_v9, %v4065_v61  ;;  %v1339_v37 = vunpack.c.l.b16 %v1296_v25  ;;  %v895_v28 = vsel %vm384_vm7, %v4337_v63, %v894_v29  ;;  %v930_v12 = vrot.slane %v887_v19, 4 }
 0x231   :  { %v903_v3 = vperm.slane %v895_v28, %v4065_v61  ;;  %v1007_v41 = vsel %vm384_vm7, %v4769_v46, %v1006_v0  ;;  %v1340_v17 = vunpack.c.l.b16 %v1297_v52  ;;  %v1042_v22 = vrot.slane %v999_v11, 4 }
 0x232   :  { %v1052_v51 = vrot.slane %v1039_v40, 4  ;;  %v1015_v38 = vperm.slane %v1007_v41, %v4065_v61  ;;  %v883_v53 = vsel %vm384_vm7, %v4704_v42, %v882_v27  ;;  %v1456_v18 = vsel %vm1347_vm8, %v1451_v21, 0 }
 0x233   :  { %1539 = vmatpush.bf16.xpose.msra.mxu1 %v1508_v7  ;;  %v941_v59 = vsel %vm384_vm7, %v940_v45, %v903_v3  ;;  %v942_v7 = vrot.slane %v903_v3, 4  ;;  %v931_v4 = vsel %vm384_vm7, %v911_v24, %v930_v12  ;;  %v1341_v44 = vpack.c.b16 %v1340_v17, %v1339_v37 }
 0x234   :  { %v1053_v1 = vsel %vm384_vm7, %v1052_v51, %v1015_v38  ;;  %v1292_v10 = vmul.f32 0.25, %v941_v59  ;;  %v891_v19 = vperm.slane %v883_v53, %v4065_v61  ;;  %v1043_v32 = vsel %vm384_vm7, %v1023_v43, %v1042_v22 }
 0x235   :  { %v1293_v55 = vmul.f32 0.25, %v1053_v1  ;;  %v1282_v11 = vmul.f32 0.25, %v931_v4  ;;  %v907_v42 = vsel %vm384_vm7, %v4331_v23, %v906_v5  ;;  %3180 = vmatmul.msk.bf16.vlgmr.msra.gmra.mxu2 %vm1347_vm8, %v1341_v44  ;;  %v1283_v9 = vmul.f32 0.25, %v1043_v32 }
 0x236   :  { %v1308_v27 = vpack.c.bf16 %v1292_v10, %v1292_v10  ;;  %v915_v20 = vperm.slane %v907_v42, %v4065_v61  ;;  %v995_v24 = vsel %vm384_vm7, %v4724_v50, %v994_v8  ;;  %1465 = vmatpush.bf16.xpose.msra.mxu2 %v1456_v18  ;;  %v1054_v25 = vrot.slane %v1015_v38, 4 }
 0x237   :  { %v1309_v29 = vpack.c.bf16 %v1293_v55, %v1293_v55  ;;  %v1298_v21 = vpack.c.bf16 %v1282_v11, %v1282_v11  ;;  %v5415_v45 = vrot.slane %v4516_v14, 4  ;;  %v1299_v0 = vpack.c.bf16 %v1283_v9, %v1283_v9 }
 0x238   :  { %v932_v23 = vrot.slane %v915_v20, 4  ;;  %v1003_v5 = vperm.slane %v995_v24, %v4065_v61  ;;  %v892_v37 = vrot.slane %v4337_v63, 4  ;;  %v916_v28 = vrot.slane %v4340_v13, 4 }
 0x239   :  { %v1019_v43 = vsel %vm384_vm7, %v4527_v35, %v5415_v45  ;;  %v1496_v50 = vunpack.c.l.b16 %v1308_v27  ;;  %v1497_v8 = vunpack.c.l.b16 %v1309_v29  ;;  %v1370_v3 = vunpack.c.l.b16 %v1298_v21 }
 0x23a   :  { %v1027_v52 = vperm.slane %v1019_v43, %v4065_v61  ;;  %v1371_v41 = vunpack.c.l.b16 %v1299_v0  ;;  %v933_v51 = vsel %vm384_vm7, %v932_v23, %v891_v19  ;;  %v943_v35 = vsel %vm384_vm7, %v4754_v26, %v942_v7 }
 0x23b   :  { %v1498_v12 = vpack.c.b16 %v1497_v8, %v1496_v50  ;;  %v1284_v17 = vmul.f32 0.25, %v933_v51  ;;  %v1161_v38 = vsel %vm384_vm7, %v1160_v36, %v4536_v60  ;;  %v1055_v22 = vsel %vm384_vm7, %v1039_v40, %v1054_v25 }
 0x23c   :  { %v1044_v14 = vrot.slane %v1027_v52, 4  ;;  %v1372_v63 = vpack.c.b16 %v1371_v41, %v1370_v3  ;;  %v1273_v53 = vsel %vm384_vm7, %v1272_v48, %v4589_v47  ;;  %v917_v59 = vsel %vm384_vm7, %v916_v28, %v4310_v2 }
 0x23d   :  { %v1004_v26 = vrot.slane %v4769_v46, 4  ;;  %3186 = vmatmul.msk.bf16.vlgmr.msrb.gmra.mxu1 %vm1347_vm8, %v1498_v12  ;;  %v1320_v7 = vpack.c.bf16 %v1161_v38, %v1161_v38  ;;  %v1300_v60 = vpack.c.bf16 %v1284_v17, %v1284_v17  ;;  %v1321_v36 = vpack.c.bf16 %v1273_v53, %v1273_v53 }
 0x23e   :  { %v1045_v13 = vsel %vm384_vm7, %v1044_v14, %v1003_v5  ;;  %1831 = vmatpush.bf16.msrb.mxu1 %v4645_v15  ;;  %3181 = vmatmul.msk.bf16.vlgmr.msra.gmra.mxu3 %vm1347_vm8, %v1372_v63  ;;  %v934_v40 = vrot.slane %v891_v19, 4  ;;  %v1046_v4 = vrot.slane %v1003_v5, 4  ;;  %v1028_v62 = vrot.slane %v4541_v34, 4 }
 0x23f   :  { %v1285_v54 = vmul.f32 0.25, %v1045_v13  ;;  %1487 = vmatpush.bf16.xpose.msra.mxu3 %v1456_v18  ;;  %v1294_v48 = vmul.f32 0.25, %v943_v35  ;;  %v1295_v2 = vmul.f32 0.25, %v1055_v22  ;;  %v1745_v44 = vunpack.c.l.b16 %v1320_v7 }
 0x240   :  { %v935_v46 = vsel %vm384_vm7, %v915_v20, %v934_v40  ;;  %v1047_v1 = vsel %vm384_vm7, %v1027_v52, %v1046_v4  ;;  %v893_v15 = vsel %vm384_vm7, %v892_v37, %v4751_v6  ;;  %v1746_v55 = vunpack.c.l.b16 %v1321_v36 }
 0x241   :  { %v1301_v47 = vpack.c.bf16 %v1285_v54, %v1285_v54  ;;  %v1286_v32 = vmul.f32 0.25, %v935_v46  ;;  %v1287_v11 = vmul.f32 0.25, %v1047_v1  ;;  %v1392_v19 = vunpack.c.l.b16 %v1300_v60 }
 0x242   :  { %v923_v42 = vperm.slane %v917_v59, %v4065_v61  ;;  %v1005_v34 = vsel %vm384_vm7, %v1004_v26, %v4760_v16  ;;  %v1310_v18 = vpack.c.bf16 %v1294_v48, %v1294_v48  ;;  %v1311_v27 = vpack.c.bf16 %v1295_v2, %v1295_v2 }
 0x243   :  { %v1393_v10 = vunpack.c.l.b16 %v1301_v47  ;;  %v899_v9 = vperm.slane %v893_v15, %v4065_v61  ;;  %v1303_v24 = vpack.c.bf16 %v1287_v11, %v1287_v11  ;;  %v1029_v6 = vsel %vm384_vm7, %v1028_v62, %v4512_v58 }
 0x244   :  { %v936_v25 = vrot.slane %v923_v42, 4  ;;  %v1747_v29 = vpack.c.b16 %v1746_v55, %v1745_v44  ;;  %v1302_v21 = vpack.c.bf16 %v1286_v32, %v1286_v32  ;;  %v1011_v45 = vperm.slane %v1005_v34, %v4065_v61 }
 0x245   :  { %v1394_v20 = vpack.c.b16 %v1393_v10, %v1392_v19  ;;  %v1035_v43 = vperm.slane %v1029_v6, %v4065_v61  ;;  %v1164_v16 = vrot.slane %v4640_v57, 4  ;;  %v1276_v0 = vrot.slane %v4657_v49, 4 }
 0x246   :  { %v1527_v23 = vunpack.c.l.b16 %v1311_v27  ;;  %v937_v5 = vsel %vm384_vm7, %v936_v25, %v899_v9  ;;  %v1423_v37 = vunpack.c.l.b16 %v1303_v24  ;;  %v1526_v28 = vunpack.c.l.b16 %v1310_v18 }
 0x247   :  { %3182 = vmatmul.msk.bf16.vlgmr.msrb.gmra.mxu2 %vm1347_vm8, %v1394_v20  ;;  %v1048_v52 = vrot.slane %v1035_v43, 4  ;;  %v1422_v58 = vunpack.c.l.b16 %v1302_v21  ;;  %v1050_v8 = vrot.slane %v1011_v45, 4  ;;  %v1288_v3 = vmul.f32 0.25, %v937_v5 }
 0x248   :  { %1759 = vmatpush.bf16.msrb.mxu2 %v1747_v29  ;;  %v1165_v51 = vsel %vm384_vm7, %v1164_v16, %v4637_v30  ;;  %v1277_v57 = vsel %vm384_vm7, %v1276_v0, %v4654_v33  ;;  %v1528_v49 = vpack.c.b16 %v1527_v23, %v1526_v28  ;;  %v938_v14 = vrot.slane %v899_v9, 4 }
 0x249   :  { %v1049_v50 = vsel %vm384_vm7, %v1048_v52, %v1011_v45  ;;  %v1424_v12 = vpack.c.b16 %v1423_v37, %v1422_v58  ;;  %v1324_v35 = vpack.c.bf16 %v1165_v51, %v1165_v51  ;;  %v1325_v38 = vpack.c.bf16 %v1277_v57, %v1277_v57 }
 0x24a   :  { %v1289_v41 = vmul.f32 0.25, %v1049_v50  ;;  %v1051_v63 = vsel %vm384_vm7, %v1035_v43, %v1050_v8  ;;  %v1304_v13 = vpack.c.bf16 %v1288_v3, %v1288_v3  ;;  %v939_v30 = vsel %vm384_vm7, %v923_v42, %v938_v14 }
 0x24b   :  { %v1291_v33 = vmul.f32 0.25, %v1051_v63  ;;  %v1845_v53 = vunpack.c.l.b16 %v1324_v35  ;;  %v1846_v59 = vunpack.c.l.b16 %v1325_v38  ;;  %v1290_v54 = vmul.f32 0.25, %v939_v30 }
 0x24c   :  { %v1305_v17 = vpack.c.bf16 %v1289_v41, %v1289_v41  ;;  %v1444_v26 = vunpack.c.l.b16 %v1304_v13  ;;  %v1328_v47 = vlaneseq  ;;  %v3912_v44 = vmov -1e+30  }
 0x24d   :  { %3187 = vmatmul.msk.bf16.vlgmr.msra.gmra.mxu1 %vm1347_vm8, %v1528_v49  ;;  %v1307_v60 = vpack.c.bf16 %v1291_v33, %v1291_v33  ;;  %v1847_v36 = vpack.c.b16 %v1846_v59, %v1845_v53  ;;  %v1306_v40 = vpack.c.bf16 %v1290_v54, %v1290_v54 }
 0x24e   :  { %1931 = vmatpush.bf16.msra.mxu1 %v4683_v31  ;;  %3183 = vmatmul.msk.bf16.vlgmr.msrb.gmra.mxu3 %vm1347_vm8, %v1424_v12  ;;  %v1445_v22 = vunpack.c.l.b16 %v1305_v17  ;;  %v1329_v48 = vshrl.u32 %v1328_v47, 7  ;;  %v1332_v2 = vand.u32 127, %v1328_v47 }
 0x24f   :  { %1781 = vmatpush.bf16.msrb.mxu3 %v1747_v29  ;;  %v1475_v31 = vunpack.c.l.b16 %v1307_v60  ;;  %v1474_v4 = vunpack.c.l.b16 %v1306_v40 }
 0x250   :  { %v1446_v7 = vpack.c.b16 %v1445_v22, %v1444_v26  ;;  %vm1333_vm9 = vcmp.le.s32.totalorder %v1332_v2, %v1329_v48  ;;  %v1330_v10 = vadd.s32 8, %v1329_v48 }
 0x251   :  { %v1476_v62 = vpack.c.b16 %v1475_v31, %v1474_v4  ;;  %v1335_v46 = vsel %vm1333_vm9, 0.0, %v3912_v44 }
 0x252   :  { %vm1334_vm10 = vcmp.le.s32.totalorder %v1332_v2, %v1330_v10 }
 0x253   :  { %v1336_v11 = vsel %vm1334_vm10, 0.0, %v3912_v44 }
 0x257   :  { %3184 = vmatmul.msk.bf16.vlgmr.msra.gmra.mxu2 %vm1347_vm8, %v1446_v7 }
 0x258   :  { %1859 = vmatpush.bf16.msra.mxu2 %v1847_v36 }
 0x25e   :  { %3185 = vmatmul.msk.bf16.vlgmr.msra.gmra.mxu3 %vm1347_vm8, %v1476_v62 }
 0x25f   :  { %1881 = vmatpush.bf16.msra.mxu3 %v1847_v36 }
 0x2b8   :  { %v1363_v1 = vpop.f32.mrf.mxu2 }
 0x2b9   :  { %v4851_v15 = vadd.f32 %v1363_v1, %v1335_v46 }
 0x2ba   :  { %v1519_v21 = vpop.f32.mrf.mxu1 }
 0x2bb   :  { %v1546_v55 = vsel %vm1347_vm8, %v4851_v15, -inf  ;;  %v4897_v38 = vadd.f32 %v1519_v21, %v1335_v46 }
 0x2bc   :  { %1547 = vmax.xlane.f32.xlu1 %v1546_v55 }
 0x2bd   :  { %v1582_v33 = vsel %vm1347_vm8, %v4897_v38, -inf }
 0x2c0   :  { %v1365_v19 = vpop.f32.mrf.mxu2 }
 0x2c1   :  { %v1385_v32 = vpop.f32.mrf.mxu3  ;;  %v4857_v34 = vadd.f32 %v1365_v19, %v1336_v11 }
 0x2c2   :  { %v4855_v42 = vadd.f32 %v1385_v32, %v1335_v46  ;;  %v1521_v28 = vpop.f32.mrf.mxu1 }
 0x2c3   :  { %v1549_v27 = vsel %vm1347_vm8, %v4857_v34, -inf  ;;  %v4895_v35 = vadd.f32 %v1521_v28, %v1336_v11 }
 0x2c4   :  { %v1552_v18 = vsel %vm1347_vm8, %v4855_v42, -inf  ;;  %1550 = vmax.xlane.f32.xlu2 %v1549_v27 }
 0x2c5   :  { %1553 = vmax.xlane.f32.xlu0 %v1552_v18  ;;  %v1585_v22 = vsel %vm1347_vm8, %v4895_v35, -inf }
 0x2c9   :  { %v1387_v9 = vpop.f32.mrf.mxu3 }
 0x2ca   :  { %v1415_v20 = vpop.f32.mrf.mxu2  ;;  %v4863_v24 = vadd.f32 %v1387_v9, %v1336_v11  ;;  %v1541_v14 = vpop.f32.mrf.mxu1 }
 0x2cb   :  { %v4865_v25 = vadd.f32 %v1415_v20, %v1335_v46  ;;  %v4907_v59 = vadd.f32 %v1541_v14, %v1335_v46 }
 0x2cc   :  { %v1555_v6 = vsel %vm1347_vm8, %v4863_v24, -inf }
 0x2cd   :  { %v1558_v29 = vsel %vm1347_vm8, %v4865_v25, -inf  ;;  %1556 = vmax.xlane.f32.xlu2 %v1555_v6  ;;  %v1588_v54 = vsel %vm1347_vm8, %v4907_v59, -inf }
 0x2ce   :  { %1559 = vmax.xlane.f32.xlu1 %v1558_v29 }
 0x2d1   :  { %v1437_v45 = vpop.f32.mrf.mxu3 }
 0x2d2   :  { %v1417_v43 = vpop.f32.mrf.mxu2  ;;  %v4871_v16 = vadd.f32 %v1437_v45, %v1335_v46  ;;  %v1543_v53 = vpop.f32.mrf.mxu1 }
 0x2d3   :  { %v4873_v0 = vadd.f32 %v1417_v43, %v1336_v11  ;;  %v4909_v26 = vadd.f32 %v1543_v53, %v1336_v11 }
 0x2d4   :  { %v1564_v5 = vsel %vm1347_vm8, %v4871_v16, -inf }
 0x2d5   :  { %v1561_v23 = vsel %vm1347_vm8, %v4873_v0, -inf  ;;  %1565 = vmax.xlane.f32.xlu2 %v1564_v5  ;;  %v1591_v7 = vsel %vm1347_vm8, %v4909_v26, -inf }
 0x2d6   :  { %1562 = vmax.xlane.f32.xlu0 %v1561_v23 }
 0x2d9   :  { %v1439_v52 = vpop.f32.mrf.mxu3 }
 0x2da   :  { %v1467_v37 = vpop.f32.mrf.mxu2  ;;  %v4879_v58 = vadd.f32 %v1439_v52, %v1336_v11 }
 0x2db   :  { %v4881_v50 = vadd.f32 %v1467_v37, %v1335_v46 }
 0x2dc   :  { %v1567_v8 = vsel %vm1347_vm8, %v4879_v58, -inf }
 0x2dd   :  { %v1570_v3 = vsel %vm1347_vm8, %v4881_v50, -inf  ;;  %1568 = vmax.xlane.f32.xlu1 %v1567_v8 }
 0x2de   :  { %1571 = vmax.xlane.f32.xlu0 %v1570_v3 }
 0x2e1   :  { %v1489_v41 = vpop.f32.mrf.mxu3 }
 0x2e2   :  { %v1469_v51 = vpop.f32.mrf.mxu2  ;;  %v4887_v57 = vadd.f32 %v1489_v41, %v1335_v46 }
 0x2e3   :  { %v4889_v49 = vadd.f32 %v1469_v51, %v1336_v11 }
 0x2e4   :  { %v1576_v12 = vsel %vm1347_vm8, %v4887_v57, -inf }
 0x2e5   :  { %v1573_v17 = vsel %vm1347_vm8, %v4889_v49, -inf  ;;  %1577 = vmax.xlane.f32.xlu1 %v1576_v12 }
 0x2e6   :  { %1574 = vmax.xlane.f32.xlu2 %v1573_v17 }
 0x2e9   :  { %v1491_v63 = vpop.f32.mrf.mxu3 }
 0x2ea   :  { %v4899_v13 = vadd.f32 %v1491_v63, %v1336_v11 }
 0x2ec   :  { %v1579_v30 = vsel %vm1347_vm8, %v4899_v13, -inf }
 0x2ed   :  { %1580 = vmax.xlane.f32.xlu0 %v1579_v30  ;;  %1586 = vmax.xlane.f32.xlu1 %v1585_v22 }
 0x2ee   :  { %1583 = vmax.xlane.f32.xlu2 %v1582_v33 }
 0x2f5   :  { %1589 = vmax.xlane.f32.xlu0 %v1588_v54 }
 0x2f6   :  { %1592 = vmax.xlane.f32.xlu2 %v1591_v7 }
 0x32f   :  { %v1548_v60 = vpop.xlane.xlu1 %1547 }
 0x330   :  { %v1594_v36 = vsub.f32 %v4851_v15, %v1548_v60 }
 0x332   :  { %v1610_v40 = vmul.f32 1.442695, %v1594_v36 }
 0x334   :  { %3602 = vpow2.f32 %v1610_v40 }
 0x337   :  { %v1551_v4 = vpop.xlane.xlu2 %1550 }
 0x338   :  { %v1554_v31 = vpop.xlane.xlu0 %1553  ;;  %v1595_v47 = vsub.f32 %v4857_v34, %v1551_v4 }
 0x339   :  { %v1596_v62 = vsub.f32 %v4855_v42, %v1554_v31 }
 0x33a   :  { %v4918_v48 = vpop.eup %3602  ;;  %v1612_v44 = vmul.f32 1.442695, %v1595_v47 }
 0x33b   :  { %v1614_v2 = vmul.f32 1.442695, %v1596_v62  ;;  %v1642_v46 = vsel %vm1347_vm8, %v4918_v48, 0.0 }
 0x33c   :  { %1643 = vadd.xlane.f32.xlu1 %v1642_v46 }
 0x33d   :  { %3604 = vpow2.f32 %v1614_v2 }
 0x33e   :  { %3606 = vpow2.f32 %v1612_v44 }
 0x340   :  { %v1557_v1 = vpop.xlane.xlu2 %1556 }
 0x341   :  { %v1560_v15 = vpop.xlane.xlu1 %1559  ;;  %v1597_v10 = vsub.f32 %v4863_v24, %v1557_v1 }
 0x342   :  { %v1598_v55 = vsub.f32 %v4865_v25, %v1560_v15 }
 0x343   :  { %v4924_v32 = vpop.eup %3604  ;;  %v1616_v11 = vmul.f32 1.442695, %v1597_v10 }
 0x344   :  { %v1618_v19 = vmul.f32 1.442695, %v1598_v55  ;;  %v4926_v42 = vpop.eup %3606  ;;  %v1648_v34 = vsel %vm1347_vm8, %v4924_v32, 0.0 }
 0x345   :  { %1649 = vadd.xlane.f32.xlu2 %v1648_v34  ;;  %3608 = vpow2.f32 %v1616_v11  ;;  %v1645_v18 = vsel %vm1347_vm8, %v4926_v42, 0.0 }
 0x346   :  { %3610 = vpow2.f32 %v1618_v19  ;;  %1646 = vadd.xlane.f32.xlu0 %v1645_v18 }
 0x348   :  { %v1566_v9 = vpop.xlane.xlu2 %1565 }
 0x349   :  { %v1563_v27 = vpop.xlane.xlu0 %1562  ;;  %v1600_v24 = vsub.f32 %v4871_v16, %v1566_v9 }
 0x34a   :  { %v1599_v20 = vsub.f32 %v4873_v0, %v1563_v27 }
 0x34b   :  { %v4934_v25 = vpop.eup %3608  ;;  %v1622_v29 = vmul.f32 1.442695, %v1600_v24 }
 0x34c   :  { %v1620_v6 = vmul.f32 1.442695, %v1599_v20  ;;  %v4936_v21 = vpop.eup %3610  ;;  %v1651_v45 = vsel %vm1347_vm8, %v4934_v25, 0.0 }
 0x34d   :  { %1652 = vadd.xlane.f32.xlu1 %v1651_v45  ;;  %v1654_v43 = vsel %vm1347_vm8, %v4936_v21, 0.0 }
 0x34e   :  { %3612 = vpow2.f32 %v1620_v6  ;;  %1655 = vadd.xlane.f32.xlu0 %v1654_v43 }
 0x34f   :  { %3614 = vpow2.f32 %v1622_v29 }
 0x350   :  { %v1569_v23 = vpop.xlane.xlu1 %1568 }
 0x351   :  { %v1572_v0 = vpop.xlane.xlu0 %1571  ;;  %v1601_v16 = vsub.f32 %v4879_v58, %v1569_v23 }
 0x352   :  { %v1602_v5 = vsub.f32 %v4881_v50, %v1572_v0 }
 0x353   :  { %v1624_v37 = vmul.f32 1.442695, %v1601_v16 }
 0x354   :  { %v4944_v52 = vpop.eup %3612  ;;  %v1626_v28 = vmul.f32 1.442695, %v1602_v5 }
 0x355   :  { %v4946_v8 = vpop.eup %3614  ;;  %v1657_v3 = vsel %vm1347_vm8, %v4944_v52, 0.0  ;;  %3616 = vpow2.f32 %v1624_v37 }
 0x356   :  { %1658 = vadd.xlane.f32.xlu2 %v1657_v3  ;;  %v1660_v41 = vsel %vm1347_vm8, %v4946_v8, 0.0  ;;  %3618 = vpow2.f32 %v1626_v28 }
 0x357   :  { %1661 = vadd.xlane.f32.xlu1 %v1660_v41 }
 0x358   :  { %v1578_v51 = vpop.xlane.xlu1 %1577 }
 0x359   :  { %v1575_v58 = vpop.xlane.xlu2 %1574  ;;  %v1604_v50 = vsub.f32 %v4887_v57, %v1578_v51 }
 0x35a   :  { %v1603_v14 = vsub.f32 %v4889_v49, %v1575_v58 }
 0x35b   :  { %v4954_v12 = vpop.eup %3616  ;;  %v1630_v17 = vmul.f32 1.442695, %v1604_v50 }
 0x35c   :  { %v1628_v63 = vmul.f32 1.442695, %v1603_v14  ;;  %v4956_v30 = vpop.eup %3618  ;;  %v1663_v22 = vsel %vm1347_vm8, %v4954_v12, 0.0 }
 0x35d   :  { %3620 = vpow2.f32 %v1630_v17  ;;  %1664 = vadd.xlane.f32.xlu0 %v1663_v22  ;;  %v1666_v33 = vsel %vm1347_vm8, %v4956_v30, 0.0 }
 0x35e   :  { %3622 = vpow2.f32 %v1628_v63  ;;  %1667 = vadd.xlane.f32.xlu2 %v1666_v33 }
 0x360   :  { %v1581_v53 = vpop.xlane.xlu0 %1580  ;;  %v1587_v57 = vpop.xlane.xlu1 %1586 }
 0x361   :  { %v1605_v49 = vsub.f32 %v4899_v13, %v1581_v53  ;;  %v1607_v54 = vsub.f32 %v4895_v35, %v1587_v57  ;;  %v1584_v7 = vpop.xlane.xlu2 %1583 }
 0x362   :  { %v1606_v60 = vsub.f32 %v4897_v38, %v1584_v7 }
 0x363   :  { %v4965_v36 = vpop.eup %3620  ;;  %v1632_v40 = vmul.f32 1.442695, %v1605_v49  ;;  %v1636_v31 = vmul.f32 1.442695, %v1607_v54 }
 0x364   :  { %v4967_v4 = vpop.eup %3622  ;;  %v1672_v62 = vsel %vm1347_vm8, %v4965_v36, 0.0  ;;  %v1634_v47 = vmul.f32 1.442695, %v1606_v60 }
 0x365   :  { %3624 = vpow2.f32 %v1632_v40  ;;  %1673 = vadd.xlane.f32.xlu0 %v1672_v62  ;;  %v1669_v13 = vsel %vm1347_vm8, %v4967_v4, 0.0 }
 0x366   :  { %3626 = vpow2.f32 %v1636_v31  ;;  %1670 = vadd.xlane.f32.xlu1 %v1669_v13 }
 0x367   :  { %3628 = vpow2.f32 %v1634_v47 }
 0x368   :  { %v1590_v35 = vpop.xlane.xlu0 %1589 }
 0x369   :  { %v1608_v38 = vsub.f32 %v4907_v59, %v1590_v35  ;;  %v1593_v2 = vpop.xlane.xlu2 %1592 }
 0x36a   :  { %v1609_v44 = vsub.f32 %v4909_v26, %v1593_v2 }
 0x36b   :  { %v4975_v46 = vpop.eup %3624  ;;  %v1638_v1 = vmul.f32 1.442695, %v1608_v38 }
 0x36c   :  { %v4977_v15 = vpop.eup %3626  ;;  %v1675_v10 = vsel %vm1347_vm8, %v4975_v46, 0.0  ;;  %v1640_v55 = vmul.f32 1.442695, %v1609_v44 }
 0x36d   :  { %v4981_v11 = vpop.eup %3628  ;;  %3630 = vpow2.f32 %v1638_v1  ;;  %1676 = vadd.xlane.f32.xlu2 %v1675_v10  ;;  %v1681_v19 = vsel %vm1347_vm8, %v4977_v15, 0.0 }
 0x36e   :  { %1682 = vadd.xlane.f32.xlu0 %v1681_v19  ;;  %3632 = vpow2.f32 %v1640_v55  ;;  %v1678_v59 = vsel %vm1347_vm8, %v4981_v11, 0.0 }
 0x36f   :  { %1679 = vadd.xlane.f32.xlu1 %v1678_v59 }
 0x373   :  { %v4987_v26 = vpop.eup %3630 }
 0x374   :  { %v4989_v34 = vpop.eup %3632  ;;  %v1684_v18 = vsel %vm1347_vm8, %v4987_v26, 0.0 }
 0x375   :  { %1685 = vadd.xlane.f32.xlu2 %v1684_v18  ;;  %v1687_v27 = vsel %vm1347_vm8, %v4989_v34, 0.0 }
 0x377   :  { %1688 = vadd.xlane.f32.xlu1 %v1687_v27 }
 0x3af   :  { %v1644_v9 = vpop.xlane.xlu1 %1643 }
 0x3b0   :  { %3634 = vrcp.f32 %v1644_v9 }
 0x3b6   :  { %v3635_v6 = vpop.eup %3634 }
 0x3b7   :  { %v1706_v29 = vmul.f32 %v3635_v6, %v4918_v48 }
 0x3b8   :  { %v1650_v20 = vpop.xlane.xlu2 %1649 }
 0x3b9   :  { %v1647_v24 = vpop.xlane.xlu0 %1646  ;;  %v1722_v0 = vpack.c.bf16 %v1706_v29, %v1706_v29 }
 0x3ba   :  { %3636 = vrcp.f32 %v1647_v24 }
 0x3bb   :  { %3638 = vrcp.f32 %v1650_v20  ;;  %v1740_v3 = vunpack.c.l.b16 %v1722_v0 }
 0x3c0   :  { %v3637_v45 = vpop.eup %3636  ;;  %v1653_v43 = vpop.xlane.xlu1 %1652 }
 0x3c1   :  { %v3639_v23 = vpop.eup %3638  ;;  %v1707_v16 = vmul.f32 %v3637_v45, %v4926_v42  ;;  %v1656_v5 = vpop.xlane.xlu0 %1655  ;;  %3640 = vrcp.f32 %v1653_v43 }
 0x3c2   :  { %3642 = vrcp.f32 %v1656_v5  ;;  %v1708_v28 = vmul.f32 %v3639_v23, %v4924_v32 }
 0x3c3   :  { %v1723_v37 = vpack.c.bf16 %v1707_v16, %v1707_v16 }
 0x3c4   :  { %v1724_v50 = vpack.c.bf16 %v1708_v28, %v1708_v28 }
 0x3c5   :  { %v1741_v41 = vunpack.c.l.b16 %v1723_v37 }
 0x3c6   :  { %v1768_v22 = vunpack.c.l.b16 %v1724_v50 }
 0x3c7   :  { %v3641_v51 = vpop.eup %3640  ;;  %v1742_v58 = vpack.c.b16 %v1741_v41, %v1740_v3 }
 0x3c8   :  { %v1709_v14 = vmul.f32 %v3641_v51, %v4934_v25  ;;  %v3643_v17 = vpop.eup %3642 }
 0x3c9   :  { %v1659_v48 = vpop.xlane.xlu2 %1658  ;;  %3188 = vmatmul.msk.bf16.vlgmr.msrb.gmra.mxu2 %vm1347_vm8, %v1742_v58  ;;  %v1710_v33 = vmul.f32 %v3643_v17, %v4936_v21 }
 0x3ca   :  { %3644 = vrcp.f32 %v1659_v48  ;;  %v1662_v63 = vpop.xlane.xlu1 %1661  ;;  %v1725_v42 = vpack.c.bf16 %v1709_v14, %v1709_v14 }
 0x3cb   :  { %3646 = vrcp.f32 %v1662_v63  ;;  %v1726_v49 = vpack.c.bf16 %v1710_v33, %v1710_v33 }
 0x3cc   :  { %v1769_v53 = vunpack.c.l.b16 %v1725_v42 }
 0x3cd   :  { %v1790_v31 = vunpack.c.l.b16 %v1726_v49 }
 0x3ce   :  { %v1770_v32 = vpack.c.b16 %v1769_v53, %v1768_v22 }
 0x3d0   :  { %v3645_v57 = vpop.eup %3644  ;;  %v1665_v7 = vpop.xlane.xlu0 %1664  ;;  %3189 = vmatmul.msk.bf16.vlgmr.msrb.gmra.mxu3 %vm1347_vm8, %v1770_v32 }
 0x3d1   :  { %v1711_v54 = vmul.f32 %v3645_v57, %v4944_v52  ;;  %v3647_v25 = vpop.eup %3646  ;;  %3648 = vrcp.f32 %v1665_v7  ;;  %v1668_v60 = vpop.xlane.xlu2 %1667 }
 0x3d2   :  { %v1712_v47 = vmul.f32 %v3647_v25, %v4946_v8  ;;  %3650 = vrcp.f32 %v1668_v60 }
 0x3d3   :  { %v1727_v40 = vpack.c.bf16 %v1711_v54, %v1711_v54 }
 0x3d4   :  { %v1728_v35 = vpack.c.bf16 %v1712_v47, %v1712_v47 }
 0x3d5   :  { %v1791_v62 = vunpack.c.l.b16 %v1727_v40 }
 0x3d6   :  { %v1818_v10 = vunpack.c.l.b16 %v1728_v35 }
 0x3d7   :  { %v1792_v13 = vpack.c.b16 %v1791_v62, %v1790_v31  ;;  %v3649_v21 = vpop.eup %3648 }
 0x3d8   :  { %v1713_v38 = vmul.f32 %v3649_v21, %v4954_v12  ;;  %v1674_v2 = vpop.xlane.xlu0 %1673  ;;  %v3651_v44 = vpop.eup %3650 }
 0x3d9   :  { %3190 = vmatmul.msk.bf16.vlgmr.msrb.gmra.mxu0 %vm1347_vm8, %v1792_v13  ;;  %v1671_v52 = vpop.xlane.xlu1 %1670  ;;  %v1714_v19 = vmul.f32 %v3651_v44, %v4956_v30 }
 0x3da   :  { %v1729_v1 = vpack.c.bf16 %v1713_v38, %v1713_v38  ;;  %3652 = vrcp.f32 %v1671_v52 }
 0x3db   :  { %3654 = vrcp.f32 %v1674_v2  ;;  %v1730_v9 = vpack.c.bf16 %v1714_v19, %v1714_v19 }
 0x3dc   :  { %v1819_v55 = vunpack.c.l.b16 %v1729_v1 }
 0x3dd   :  { %v1840_v45 = vunpack.c.l.b16 %v1730_v9 }
 0x3de   :  { %v1820_v59 = vpack.c.b16 %v1819_v55, %v1818_v10 }
 0x3e0   :  { %v3653_v8 = vpop.eup %3652  ;;  %v1677_v18 = vpop.xlane.xlu2 %1676  ;;  %3191 = vmatmul.msk.bf16.vlgmr.msrb.gmra.mxu1 %vm1347_vm8, %v1820_v59 }
 0x3e1   :  { %v3655_v27 = vpop.eup %3654  ;;  %v1715_v12 = vmul.f32 %v3653_v8, %v4967_v4  ;;  %3656 = vrcp.f32 %v1677_v18  ;;  %v1683_v20 = vpop.xlane.xlu0 %1682 }
 0x3e2   :  { %3658 = vrcp.f32 %v1683_v20  ;;  %v1680_v24 = vpop.xlane.xlu1 %1679  ;;  %v1716_v29 = vmul.f32 %v3655_v27, %v4965_v36 }
 0x3e3   :  { %v1731_v6 = vpack.c.bf16 %v1715_v12, %v1715_v12  ;;  %3660 = vrcp.f32 %v1680_v24 }
 0x3e4   :  { %v1732_v16 = vpack.c.bf16 %v1716_v29, %v1716_v29 }
 0x3e5   :  { %v1841_v43 = vunpack.c.l.b16 %v1731_v6 }
 0x3e6   :  { %v1868_v58 = vunpack.c.l.b16 %v1732_v16 }
 0x3e7   :  { %v3657_v30 = vpop.eup %3656  ;;  %v1842_v23 = vpack.c.b16 %v1841_v43, %v1840_v45 }
 0x3e8   :  { %v3659_v0 = vpop.eup %3658  ;;  %v1717_v5 = vmul.f32 %v3657_v30, %v4975_v46  ;;  %v1686_v37 = vpop.xlane.xlu2 %1685 }
 0x3e9   :  { %v3661_v28 = vpop.eup %3660  ;;  %v1719_v4 = vmul.f32 %v3659_v0, %v4977_v15  ;;  %3662 = vrcp.f32 %v1686_v37  ;;  %3192 = vmatmul.msk.bf16.vlgmr.msra.gmra.mxu2 %vm1347_vm8, %v1842_v23 }
 0x3ea   :  { %v1733_v3 = vpack.c.bf16 %v1717_v5, %v1717_v5  ;;  %v1718_v41 = vmul.f32 %v3661_v28, %v4981_v11  ;;  %v1689_v51 = vpop.xlane.xlu1 %1688 }
 0x3eb   :  { %v1735_v36 = vpack.c.bf16 %v1719_v4, %v1719_v4  ;;  %3664 = vrcp.f32 %v1689_v51 }
 0x3ec   :  { %v1869_v50 = vunpack.c.l.b16 %v1733_v3  ;;  %v1734_v14 = vpack.c.bf16 %v1718_v41, %v1718_v41 }
 0x3ed   :  { %v1891_v17 = vunpack.c.l.b16 %v1735_v36 }
 0x3ee   :  { %v1870_v48 = vpack.c.b16 %v1869_v50, %v1868_v58  ;;  %v1890_v63 = vunpack.c.l.b16 %v1734_v14 }
 0x3ef   :  { %v3663_v46 = vpop.eup %3662 }
 0x3f0   :  { %v1892_v42 = vpack.c.b16 %v1891_v17, %v1890_v63  ;;  %v1720_v22 = vmul.f32 %v3663_v46, %v4987_v26  ;;  %3193 = vmatmul.msk.bf16.vlgmr.msra.gmra.mxu3 %vm1347_vm8, %v1870_v48 }
 0x3f1   :  { %v3665_v15 = vpop.eup %3664 }
 0x3f2   :  { %v1736_v33 = vpack.c.bf16 %v1720_v22, %v1720_v22  ;;  %v1721_v53 = vmul.f32 %v3665_v15, %v4989_v34  ;;  %3194 = vmatmul.msk.bf16.vlgmr.msra.gmra.mxu0 %vm1347_vm8, %v1892_v42 }
 0x3f4   :  { %v1737_v11 = vpack.c.bf16 %v1721_v53, %v1721_v53  ;;  %v1918_v32 = vunpack.c.l.b16 %v1736_v33 }
 0x3f6   :  { %v1919_v57 = vunpack.c.l.b16 %v1737_v11 }
 0x3f8   :  { %v1920_v49 = vpack.c.b16 %v1919_v57, %v1918_v32 }
 0x3fa   :  { %3195 = vmatmul.msk.bf16.vlgmr.msra.gmra.mxu1 %vm1347_vm8, %v1920_v49 }
 0x44c   :  { %v1761_v7 = vpop.f32.mrf.mxu2 }
 0x44d   :  { %v1940_v40 = vrot.slane %v1761_v7, 4 }
 0x453   :  { %v1783_v25 = vpop.f32.mrf.mxu3 }
 0x454   :  { %v1763_v47 = vpop.f32.mrf.mxu2  ;;  %v1952_v34 = vrot.slane %v1783_v25, 4 }
 0x455   :  { %v2052_v52 = vrot.slane %v1763_v47, 4 }
 0x456   :  { %v1811_v54 = vpop.f32.mrf.mxu0 }
 0x457   :  { %v1938_v31 = vrot.slane %v1811_v54, 4  ;;  %v1941_v62 = vsel %vm384_vm7, %v1811_v54, %v1940_v40 }
 0x458   :  { %v1949_v38 = vperm.slane %v1941_v62, %v4048_v39 }
 0x459   :  { %v1939_v44 = vsel %vm384_vm7, %v1938_v31, %v1761_v7 }
 0x45a   :  { %v1945_v18 = vperm.slane %v1939_v44, %v4048_v39  ;;  %v2000_v27 = vrot.slane %v1949_v38, 4 }
 0x45b   :  { %v1785_v2 = vpop.f32.mrf.mxu3 }
 0x45c   :  { %v2064_v19 = vrot.slane %v1785_v2, 4  ;;  %v1988_v43 = vrot.slane %v1945_v18, 4 }
 0x45d   :  { %v1833_v60 = vpop.f32.mrf.mxu1 }
 0x45e   :  { %v1813_v26 = vpop.f32.mrf.mxu0  ;;  %v1950_v13 = vrot.slane %v1833_v60, 4  ;;  %v1953_v1 = vsel %vm384_vm7, %v1833_v60, %v1952_v34 }
 0x45f   :  { %v2050_v21 = vrot.slane %v1813_v26, 4  ;;  %v2053_v8 = vsel %vm384_vm7, %v1813_v26, %v2052_v52  ;;  %v1961_v9 = vperm.slane %v1953_v1, %v4048_v39 }
 0x460   :  { %v1951_v10 = vsel %vm384_vm7, %v1950_v13, %v1783_v25  ;;  %v2061_v6 = vperm.slane %v2053_v8, %v4048_v39 }
 0x461   :  { %v2051_v59 = vsel %vm384_vm7, %v2050_v21, %v1763_v47  ;;  %v1957_v12 = vperm.slane %v1951_v10, %v4048_v39  ;;  %v1998_v30 = vrot.slane %v1961_v9, 4  ;;  %v2001_v23 = vsel %vm384_vm7, %v1961_v9, %v2000_v27 }
 0x462   :  { %v2057_v24 = vperm.slane %v2051_v59, %v4048_v39  ;;  %v2112_v3 = vrot.slane %v2061_v6, 4  ;;  %v5037_v51 = vperm.slane %v2001_v23, %v4065_v61 }
 0x463   :  { %v1986_v16 = vrot.slane %v1957_v12, 4  ;;  %v1989_v36 = vsel %vm384_vm7, %v1957_v12, %v1988_v43  ;;  %v1999_v58 = vsel %vm384_vm7, %v1998_v30, %v1949_v38 }
 0x464   :  { %v2100_v4 = vrot.slane %v2057_v24, 4  ;;  %v1997_v33 = vperm.slane %v1989_v36, %v4065_v61  ;;  %v2005_v53 = vperm.slane %v1999_v58, %v4065_v61  ;;  %v2048_v11 = vrot.slane %v5037_v51, 4 }
 0x465   :  { %v1835_v35 = vpop.f32.mrf.mxu1  ;;  %v1987_v14 = vsel %vm384_vm7, %v1986_v16, %v1945_v18 }
 0x466   :  { %v2062_v55 = vrot.slane %v1835_v35, 4  ;;  %v2065_v20 = vsel %vm384_vm7, %v1835_v35, %v2064_v19  ;;  %v5050_v57 = vperm.slane %v1987_v14, %v4065_v61  ;;  %v2040_v35 = vrot.slane %v1997_v33, 4 }
 0x467   :  { %v2073_v0 = vperm.slane %v2065_v20, %v4048_v39  ;;  %v2044_v38 = vrot.slane %v2005_v53, 4 }
 0x468   :  { %v2063_v29 = vsel %vm384_vm7, %v2062_v55, %v1785_v2  ;;  %v2036_v27 = vrot.slane %v5050_v57, 4 }
 0x469   :  { %v2069_v5 = vperm.slane %v2063_v29, %v4048_v39  ;;  %v2110_v50 = vrot.slane %v2073_v0, 4  ;;  %v2113_v42 = vsel %vm384_vm7, %v2073_v0, %v2112_v3 }
 0x46a   :  { %v5059_v40 = vperm.slane %v2113_v42, %v4065_v61 }
 0x46b   :  { %v2098_v48 = vrot.slane %v2069_v5, 4  ;;  %v2101_v46 = vsel %vm384_vm7, %v2069_v5, %v2100_v4  ;;  %v2111_v49 = vsel %vm384_vm7, %v2110_v50, %v2061_v6 }
 0x46c   :  { %v1861_v45 = vpop.f32.mrf.mxu2  ;;  %v5056_v60 = vperm.slane %v2101_v46, %v4065_v61  ;;  %v5065_v2 = vperm.slane %v2111_v49, %v4065_v61  ;;  %v2160_v12 = vrot.slane %v5059_v40, 4 }
 0x46d   :  { %v1964_v37 = vrot.slane %v1861_v45, 4  ;;  %v2099_v25 = vsel %vm384_vm7, %v2098_v48, %v2057_v24 }
 0x46e   :  { %v5069_v44 = vperm.slane %v2099_v25, %v4065_v61  ;;  %v2152_v9 = vrot.slane %v5056_v60, 4  ;;  %v2156_v30 = vrot.slane %v5065_v2, 4 }
 0x46f   :  { %v1911_v28 = vpop.f32.mrf.mxu0 }
 0x470   :  { %v1962_v41 = vrot.slane %v1911_v28, 4  ;;  %v1965_v63 = vsel %vm384_vm7, %v1911_v28, %v1964_v37  ;;  %v2148_v5 = vrot.slane %v5069_v44, 4 }
 0x471   :  { %v1973_v7 = vperm.slane %v1965_v63, %v4048_v39 }
 0x472   :  { %v1963_v22 = vsel %vm384_vm7, %v1962_v41, %v1861_v45 }
 0x473   :  { %v1883_v17 = vpop.f32.mrf.mxu3  ;;  %v1969_v26 = vperm.slane %v1963_v22, %v4048_v39  ;;  %v2024_v1 = vrot.slane %v1973_v7, 4 }
 0x474   :  { %v1863_v15 = vpop.f32.mrf.mxu2  ;;  %v1976_v54 = vrot.slane %v1883_v17, 4 }
 0x475   :  { %v2076_v32 = vrot.slane %v1863_v15, 4  ;;  %v2012_v19 = vrot.slane %v1969_v26, 4 }
 0x477   :  { %v1913_v31 = vpop.f32.mrf.mxu0  ;;  %v1933_v62 = vpop.f32.mrf.mxu1 }
 0x478   :  { %v2074_v47 = vrot.slane %v1913_v31, 4  ;;  %v2077_v13 = vsel %vm384_vm7, %v1913_v31, %v2076_v32  ;;  %v1974_v34 = vrot.slane %v1933_v62, 4  ;;  %v1977_v21 = vsel %vm384_vm7, %v1933_v62, %v1976_v54 }
 0x479   :  { %v1985_v52 = vperm.slane %v1977_v21, %v4048_v39  ;;  %v2085_v59 = vperm.slane %v2077_v13, %v4048_v39 }
 0x47a   :  { %v2075_v10 = vsel %vm384_vm7, %v2074_v47, %v1863_v15  ;;  %v1975_v55 = vsel %vm384_vm7, %v1974_v34, %v1883_v17 }
 0x47b   :  { %v1981_v8 = vperm.slane %v1975_v55, %v4048_v39  ;;  %v2022_v18 = vrot.slane %v1985_v52, 4  ;;  %v1885_v20 = vpop.f32.mrf.mxu3  ;;  %v2025_v24 = vsel %vm384_vm7, %v1985_v52, %v2024_v1  ;;  %v2081_v6 = vperm.slane %v2075_v10, %v4048_v39 }
 0x47c   :  { %v2033_v16 = vperm.slane %v2025_v24, %v4065_v61  ;;  %v2088_v37 = vrot.slane %v1885_v20, 4  ;;  %v2136_v28 = vrot.slane %v2085_v59, 4 }
 0x47d   :  { %v2010_v29 = vrot.slane %v1981_v8, 4  ;;  %v2013_v45 = vsel %vm384_vm7, %v1981_v8, %v2012_v19  ;;  %v2023_v43 = vsel %vm384_vm7, %v2022_v18, %v1973_v7  ;;  %v2124_v50 = vrot.slane %v2081_v6, 4 }
 0x47e   :  { %v2021_v23 = vperm.slane %v2013_v45, %v4065_v61  ;;  %v2029_v0 = vperm.slane %v2023_v43, %v4065_v61  ;;  %v2046_v48 = vrot.slane %v2033_v16, 4  ;;  %v2049_v17 = vsel %vm384_vm7, %v2033_v16, %v2048_v11 }
 0x47f   :  { %v2011_v4 = vsel %vm384_vm7, %v2010_v29, %v1969_v26  ;;  %v1935_v63 = vpop.f32.mrf.mxu1  ;;  %v2198_v15 = vrot.slane %v2049_v17, 4 }
 0x480   :  { %v2017_v3 = vperm.slane %v2011_v4, %v4065_v61  ;;  %v2038_v41 = vrot.slane %v2021_v23, 4  ;;  %v5090_v36 = vsel %vm384_vm7, %v2021_v23, %v2040_v35  ;;  %v2042_v58 = vrot.slane %v2029_v0, 4 }
 0x481   :  { %v2045_v14 = vsel %vm384_vm7, %v2029_v0, %v2044_v38  ;;  %v5102_v32 = vsel %vm384_vm7, %v2046_v48, %v5037_v51  ;;  %v2174_v54 = vrot.slane %v5090_v36, 4  ;;  %v2086_v26 = vrot.slane %v1935_v63, 4 }
 0x482   :  { %v2034_v46 = vrot.slane %v2017_v3, 4  ;;  %v5095_v42 = vsel %vm384_vm7, %v2038_v41, %v1997_v33  ;;  %v5098_v22 = vsel %vm384_vm7, %v2042_v58, %v2005_v53  ;;  %v2200_v7 = vrot.slane %v2045_v14, 4 }
 0x483   :  { %v2162_v49 = vrot.slane %v5095_v42, 4  ;;  %v2186_v11 = vrot.slane %v5102_v32, 4  ;;  %v2188_v25 = vrot.slane %v5098_v22, 4  ;;  %v2089_v33 = vsel %vm384_vm7, %v1935_v63, %v2088_v37 }
 0x484   :  { %v2201_v53 = vsel %vm384_vm7, %v2049_v17, %v2200_v7  ;;  %v2097_v31 = vperm.slane %v2089_v33, %v4048_v39  ;;  %v5113_v51 = vsel %vm384_vm7, %v2034_v46, %v5050_v57  ;;  %v5116_v62 = vsel %vm384_vm7, %v2017_v3, %v2036_v27 }
 0x485   :  { %v2187_v47 = vsel %vm384_vm7, %v2186_v11, %v5098_v22  ;;  %v2199_v13 = vsel %vm384_vm7, %v2198_v15, %v2045_v14  ;;  %v2087_v34 = vsel %vm384_vm7, %v2086_v26, %v1885_v20  ;;  %v2163_v21 = vsel %vm384_vm7, %v2162_v49, %v5113_v51 }
 0x486   :  { %v5125_v35 = vperm.slane %v2201_v53, %v4048_v39  ;;  %v2093_v38 = vperm.slane %v2087_v34, %v4048_v39  ;;  %v2134_v57 = vrot.slane %v2097_v31, 4  ;;  %v2137_v52 = vsel %vm384_vm7, %v2097_v31, %v2136_v28 }
 0x487   :  { %v2145_v1 = vperm.slane %v2137_v52, %v4065_v61  ;;  %v2164_v10 = vrot.slane %v5113_v51, 4  ;;  %v2169_v55 = vperm.slane %v2163_v21, %v4048_v39  ;;  %v2175_v19 = vsel %vm384_vm7, %v2174_v54, %v5116_v62 }
 0x488   :  { %v2122_v8 = vrot.slane %v2093_v38, 4  ;;  %v2125_v18 = vsel %vm384_vm7, %v2093_v38, %v2124_v50  ;;  %v2135_v27 = vsel %vm384_vm7, %v2134_v57, %v2085_v59  ;;  %v2176_v20 = vrot.slane %v5116_v62, 4 }
 0x489   :  { %v2133_v24 = vperm.slane %v2125_v18, %v4065_v61  ;;  %v2141_v29 = vperm.slane %v2135_v27, %v4065_v61  ;;  %v2158_v45 = vrot.slane %v2145_v1, 4  ;;  %v2161_v43 = vsel %vm384_vm7, %v2145_v1, %v2160_v12 }
 0x48a   :  { %v2123_v23 = vsel %vm384_vm7, %v2122_v8, %v2081_v6  ;;  %v2310_v0 = vrot.slane %v2161_v43, 4  ;;  %v2181_v16 = vperm.slane %v2175_v19, %v4048_v39  ;;  %v2193_v37 = vperm.slane %v2187_v47, %v4048_v39 }
 0x48b   :  { %v2129_v28 = vperm.slane %v2123_v23, %v4065_v61  ;;  %v2150_v4 = vrot.slane %v2133_v24, 4  ;;  %v5147_v59 = vsel %vm384_vm7, %v2133_v24, %v2152_v9  ;;  %v2154_v3 = vrot.slane %v2141_v29, 4 }
 0x48c   :  { %v2157_v41 = vsel %vm384_vm7, %v2141_v29, %v2156_v30  ;;  %v5152_v12 = vsel %vm384_vm7, %v2158_v45, %v5059_v40  ;;  %v2286_v6 = vrot.slane %v5147_v59, 4  ;;  %v2212_v58 = vrot.slane %v2169_v55, 4 }
 0x48d   :  { %v2146_v50 = vrot.slane %v2129_v28, 4  ;;  %v5157_v14 = vsel %vm384_vm7, %v2150_v4, %v5056_v60  ;;  %v5161_v48 = vsel %vm384_vm7, %v2154_v3, %v5065_v2  ;;  %v2298_v9 = vrot.slane %v5152_v12, 4 }
 0x48e   :  { %v2274_v30 = vrot.slane %v5157_v14, 4  ;;  %v2311_v17 = vsel %vm384_vm7, %v2310_v0, %v2157_v41  ;;  %v2312_v40 = vrot.slane %v2157_v41, 4  ;;  %v2205_v63 = vperm.slane %v2199_v13, %v4048_v39 }
 0x48f   :  { %v2299_v46 = vsel %vm384_vm7, %v2298_v9, %v5161_v48  ;;  %v2147_v60 = vsel %vm384_vm7, %v2146_v50, %v5069_v44  ;;  %v5174_v2 = vsel %vm384_vm7, %v2129_v28, %v2148_v5  ;;  %v2213_v15 = vsel %vm384_vm7, %v2181_v16, %v2212_v58 }
 0x490   :  { %v2313_v49 = vsel %vm384_vm7, %v2161_v43, %v2312_v40  ;;  %v2221_v54 = vperm.slane %v2213_v15, %v4065_v61  ;;  %v2236_v7 = vrot.slane %v2193_v37, 4  ;;  %v2275_v11 = vsel %vm384_vm7, %v2274_v30, %v2147_v60 }
 0x491   :  { %v2300_v26 = vrot.slane %v5161_v48, 4  ;;  %v5182_v33 = vperm.slane %v2313_v49, %v4048_v39  ;;  %v2281_v53 = vperm.slane %v2275_v11, %v4048_v39  ;;  %v2287_v44 = vsel %vm384_vm7, %v2286_v6, %v5174_v2 }
 0x492   :  { %v2237_v5 = vsel %vm384_vm7, %v2205_v63, %v2236_v7  ;;  %v2276_v31 = vrot.slane %v2147_v60, 4  ;;  %v2293_v47 = vperm.slane %v2287_v44, %v4048_v39  ;;  %v2305_v13 = vperm.slane %v2299_v46, %v4048_v39 }
 0x493   :  { %v2245_v34 = vperm.slane %v2237_v5, %v4065_v61  ;;  %v2317_v21 = vperm.slane %v2311_v17, %v4048_v39  ;;  %v2324_v38 = vrot.slane %v2281_v53, 4  ;;  %v2210_v57 = vrot.slane %v2181_v16, 4 }
 0x494   :  { %v2348_v52 = vrot.slane %v2305_v13, 4  ;;  %v2234_v1 = vrot.slane %v2205_v63, 4  ;;  %v2322_v19 = vrot.slane %v2293_v47, 4  ;;  %v2264_v8 = vrot.slane %v2221_v54, 4 }
 0x495   :  { %v2262_v18 = vrot.slane %v2245_v34, 4  ;;  %v2325_v27 = vsel %vm384_vm7, %v2293_v47, %v2324_v38  ;;  %v2211_v24 = vsel %vm384_vm7, %v2210_v57, %v2169_v55  ;;  %v2346_v29 = vrot.slane %v2317_v21, 4 }
 0x496   :  { %v2333_v45 = vperm.slane %v2325_v27, %v4065_v61  ;;  %v2349_v43 = vsel %vm384_vm7, %v2317_v21, %v2348_v52  ;;  %v5197_v23 = vperm.slane %v2211_v24, %v4065_v61  ;;  %v2235_v0 = vsel %vm384_vm7, %v2234_v1, %v2193_v37 }
 0x497   :  { %v2288_v16 = vrot.slane %v5174_v2, 4  ;;  %v2357_v28 = vperm.slane %v2349_v43, %v4065_v61  ;;  %v5203_v4 = vperm.slane %v2235_v0, %v4065_v61  ;;  %v2323_v3 = vsel %vm384_vm7, %v2322_v19, %v2281_v53 }
 0x498   :  { %v2263_v55 = vsel %vm384_vm7, %v2262_v18, %v2221_v54  ;;  %v2260_v41 = vrot.slane %v5197_v23, 4  ;;  %v5209_v6 = vperm.slane %v2323_v3, %v4065_v61  ;;  %v2347_v58 = vsel %vm384_vm7, %v2346_v29, %v2305_v13 }
 0x499   :  { %v2374_v50 = vrot.slane %v2357_v28, 4  ;;  %v2258_v37 = vrot.slane %v5203_v4, 4  ;;  %v2265_v48 = vsel %vm384_vm7, %v2245_v34, %v2264_v8  ;;  %v2376_v9 = vrot.slane %v2333_v45, 4 }
 0x49a   :  { %v2353_v30 = vperm.slane %v2347_v58, %v4065_v61  ;;  %v2372_v17 = vrot.slane %v5209_v6, 4  ;;  %v2165_v40 = vsel %vm384_vm7, %v5095_v42, %v2164_v10  ;;  %v2177_v63 = vsel %vm384_vm7, %v5090_v36, %v2176_v20 }
 0x49b   :  { %v2375_v46 = vsel %vm384_vm7, %v2374_v50, %v2333_v45  ;;  %v2261_v60 = vsel %vm384_vm7, %v5203_v4, %v2260_v41  ;;  %v2377_v2 = vsel %vm384_vm7, %v2357_v28, %v2376_v9  ;;  %v2173_v15 = vperm.slane %v2165_v40, %v4048_v39 }
 0x49c   :  { %v3574_v49 = vpack.i.bf16 %v2375_v46, %v2263_v55  ;;  %v2373_v51 = vsel %vm384_vm7, %v2353_v30, %v2372_v17  ;;  %v3564_v54 = vpack.i.bf16 %v2377_v2, %v2265_v48  ;;  %v2185_v42 = vperm.slane %v2177_v63, %v4048_v39  ;;  %v3446_v2 = vld [vmem:[#allocation8 + $0x30] sm:$0xff] }
 0x49d   :  { %v3559_v10 = vpack.i.bf16 %v2373_v51, %v2261_v60  ;;  %v2189_v36 = vsel %vm384_vm7, %v5102_v32, %v2188_v25  ;;  %v2246_v62 = vrot.slane %v5125_v35, 4  ;;  %v2277_v20 = vsel %vm384_vm7, %v5157_v14, %v2276_v31  ;;  %v3443_v51 = vld [vmem:[#allocation8 + $0x18] sm:$0xff] }
 0x49e   :  { %3575 = vrot.lane.b32.xlu2 %v3574_v49, %s3907_s1  ;;  %3565 = vrot.lane.b32.xlu1 %v3564_v54, %s3909_s18  ;;  %v2197_v7 = vperm.slane %v2189_v36, %v4048_v39  ;;  %v2222_v11 = vrot.slane %v2185_v42, 4  ;;  %v2285_v53 = vperm.slane %v2277_v20, %v4048_v39  ;;  %v2289_v22 = vsel %vm384_vm7, %v5147_v59, %v2288_v16  ;;  %v3444_v49 = vld [vmem:[#allocation8 + $0x20] sm:$0xff]  ;;  %v3442_v54 = vld [vmem:[#allocation8 + $0x10] sm:$0xff] }
 0x49f   :  { %3560 = vrot.lane.b32.xlu0 %v3559_v10, %s3902_s12  ;;  %v2297_v32 = vperm.slane %v2289_v22, %v4048_v39  ;;  %v2301_v25 = vsel %vm384_vm7, %v5152_v12, %v2300_v26  ;;  %v2358_v14 = vrot.slane %v5182_v33, 4  ;;  %v2224_v44 = vrot.slane %v2173_v15, 4  ;;  %v3440_v10 = vld [vmem:[#allocation8] sm:$0xff] }
 0x4a0   :  { %v2223_v5 = vsel %vm384_vm7, %v2222_v11, %v2173_v15  ;;  %v2247_v31 = vsel %vm384_vm7, %v2246_v62, %v2197_v7  ;;  %v2309_v47 = vperm.slane %v2301_v25, %v4048_v39  ;;  %v2248_v13 = vrot.slane %v2197_v7, 4  ;;  %v3445_v15 = vld [vmem:[#allocation8 + $0x28] sm:$0xff] }
 0x4a1   :  { %v2229_v34 = vperm.slane %v2223_v5, %v4065_v61  ;;  %v2253_v59 = vperm.slane %v2247_v31, %v4065_v61  ;;  %v2334_v21 = vrot.slane %v2297_v32, 4  ;;  %v2225_v38 = vsel %vm384_vm7, %v2185_v42, %v2224_v44  ;;  %v3441_v42 = vld [vmem:[#allocation8 + $0x8] sm:$0xff] }
 0x4a2   :  { %v2359_v57 = vsel %vm384_vm7, %v2358_v14, %v2309_v47  ;;  %v2233_v12 = vperm.slane %v2225_v38, %v4065_v61  ;;  %v2249_v26 = vsel %vm384_vm7, %v5125_v35, %v2248_v13  ;;  %v2336_v52 = vrot.slane %v2285_v53, 4 }
 0x4a3   :  { %v2370_v1 = vrot.slane %v2353_v30, 4  ;;  %v2335_v19 = vsel %vm384_vm7, %v2334_v21, %v2285_v53  ;;  %v2365_v39 = vperm.slane %v2359_v57, %v4065_v61  ;;  %v2266_v8 = vrot.slane %v2253_v59, 4 }
 0x4a4   :  { %v2268_v18 = vrot.slane %v2229_v34, 4  ;;  %v2341_v27 = vperm.slane %v2335_v19, %v4065_v61  ;;  %v2337_v24 = vsel %vm384_vm7, %v2297_v32, %v2336_v52  ;;  %v2257_v45 = vperm.slane %v2249_v26, %v4065_v61 }
 0x4a5   :  { %v2378_v29 = vrot.slane %v2365_v39, 4  ;;  %v2345_v43 = vperm.slane %v2337_v24, %v4065_v61  ;;  %v2267_v35 = vsel %vm384_vm7, %v2266_v8, %v2229_v34  ;;  %v2272_v16 = vrot.slane %v2233_v12, 4 }
 0x4a6   :  { %v2380_v0 = vrot.slane %v2341_v27, 4  ;;  %v2360_v28 = vrot.slane %v2309_v47, 4  ;;  %v2259_v55 = vsel %vm384_vm7, %v2258_v37, %v5197_v23  ;;  %v2371_v41 = vsel %vm384_vm7, %v2370_v1, %v5209_v6 }
 0x4a7   :  { %v2379_v4 = vsel %vm384_vm7, %v2378_v29, %v2341_v27  ;;  %v2384_v3 = vrot.slane %v2345_v43, 4  ;;  %v2269_v58 = vsel %vm384_vm7, %v2253_v59, %v2268_v18  ;;  %v2273_v23 = vsel %vm384_vm7, %v2257_v45, %v2272_v16 }
 0x4a8   :  { %v2381_v50 = vsel %vm384_vm7, %v2365_v39, %v2380_v0  ;;  %v3569_v48 = vpack.i.bf16 %v2379_v4, %v2267_v35  ;;  %v2361_v9 = vsel %vm384_vm7, %v5182_v33, %v2360_v28  ;;  %v2270_v6 = vrot.slane %v2257_v45, 4  ;;  %v3686_v4 = vld [vmem:[#allocation2] sm:$0xff] }
 0x4a9   :  { %v3579_v30 = vpack.i.bf16 %v2381_v50, %v2269_v58  ;;  %v2369_v17 = vperm.slane %v2361_v9, %v4065_v61  ;;  %v3447_v61 = vld [vmem:[#allocation8 + $0x38] sm:$0xff]  ;;  %v3342_v9 = vld [vmem:[#allocation10 + $0xe0] sm:$0xf] }
 0x4aa   :  { %3570 = vrot.lane.b32.xlu0 %v3569_v48, %s3894_s15  ;;  %v2271_v33 = vsel %vm384_vm7, %v2270_v6, %v2233_v12  ;;  %2527 = vmatpush.bf16.msrb.mxu2 %v3447_v61  ;;  %v3687_v58 = vld [vmem:[#allocation2 + $0x8] sm:$0xff]  ;;  %v3350_v6 = vld [vmem:[#allocation10 + $0xe8] sm:$0xf] }
 0x4ab   :  { %3580 = vrot.lane.b32.xlu2 %v3579_v30, %s3905_s6  ;;  %v2385_v37 = vsel %vm384_vm7, %v2369_v17, %v2384_v3  ;;  %v2382_v40 = vrot.slane %v2369_v17, 4  ;;  %v3478_v30 = vld [vmem:[#allocation10 + $0xec] sm:$0xf0]  ;;  %v3476_v17 = vld [vmem:[#allocation10 + $0xe4] sm:$0xf] }
 0x4ac   :  { %v3589_v63 = vpack.i.bf16 %v2385_v37, %v2273_v23  ;;  %v3343_v23 = vor.u32 %v3478_v30, %v3342_v9  ;;  %v3344_v37 = vld [vmem:[#allocation10 + $0xf0] sm:$0xf0]  ;;  %v3262_v30 = vld [vmem:[#allocation10 + $0x40] sm:$0xf] }
 0x4ad   :  { %v2383_v46 = vsel %vm384_vm7, %v2382_v40, %v2345_v43  ;;  %v3479_v40 = vld [vmem:[#allocation10 + $0xf4] sm:$0xf0] }
 0x4ae   :  { %3590 = vrot.lane.b32.xlu1 %v3589_v63, %s3906_s14  ;;  %v3584_v60 = vpack.i.bf16 %v2383_v46, %v2271_v33  ;;  %2528 = vmatpush.bf16.msrb.mxu2 %v3446_v2  ;;  %v3347_v63 = vor.u32 %v3476_v17, %v3344_v37  ;;  %v3351_v46 = vor.u32 %v3479_v40, %v3350_v6  ;;  %v3477_v33 = vld [vmem:[#allocation10 + $0xec] sm:$0xf]  ;;  %v3326_v2 = vld [vmem:[#allocation10 + $0xc0] sm:$0xf]  ;;  %v3458_v40 = vld [vmem:[#allocation10 + $0x4c] sm:$0xf0] }
 0x4af   :  { %2774 = vmatpush.bf16.msrb.mxu3 %v3343_v23 }
 0x4b0   :  { %2788 = vmatpush.bf16.msrb.mxu0 %v3347_v63  ;;  %2802 = vmatpush.bf16.msrb.mxu1 %v3351_v46  ;;  %v3456_v63 = vld [vmem:[#allocation10 + $0x44] sm:$0xf] }
 0x4b2   :  { %3585 = vrot.lane.b32.xlu0 %v3584_v60, %s3908_s17  ;;  %2529 = vmatpush.bf16.msrb.mxu2 %v3445_v15  ;;  %v3352_v60 = vld [vmem:[#allocation10 + $0xf8] sm:$0xf0]  ;;  %v3474_v15 = vld [vmem:[#allocation10 + $0xcc] sm:$0xf0] }
 0x4b3   :  { %v3355_v61 = vor.u32 %v3477_v33, %v3352_v60  ;;  %v3264_v33 = vld [vmem:[#allocation10 + $0x50] sm:$0xf0]  ;;  %v3270_v60 = vld [vmem:[#allocation10 + $0x48] sm:$0xf] }
 0x4b6   :  { %2530 = vmatpush.bf16.msrb.mxu2 %v3444_v49  ;;  %v3472_v49 = vld [vmem:[#allocation10 + $0xc4] sm:$0xf] }
 0x4ba   :  { %2531 = vmatpush.bf16.msrb.mxu2 %v3443_v51 }
 0x4be   :  { %2532 = vmatpush.bf16.msrb.mxu2 %v3442_v54  ;;  %v3327_v54 = vor.u32 %v3474_v15, %v3326_v2  ;;  %v3457_v2 = vld [vmem:[#allocation10 + $0x4c] sm:$0xf]  ;;  %v3272_v15 = vld [vmem:[#allocation10 + $0x58] sm:$0xf0] }
 0x4c0   :  { %2775 = vmatpush.bf16.msrb.mxu3 %v3327_v54  ;;  %v3246_v54 = vld [vmem:[#allocation10 + $0x20] sm:$0xf] }
 0x4c2   :  { %2533 = vmatpush.bf16.msrb.mxu2 %v3441_v42  ;;  %v3328_v42 = vld [vmem:[#allocation10 + $0xd0] sm:$0xf0] }
 0x4c6   :  { %2534 = vmatpush.bf16.msrb.mxu2 %v3440_v10  ;;  %v3334_v10 = vld [vmem:[#allocation10 + $0xc8] sm:$0xf] }
 0x4ca   :  { %2816 = vmatpush.bf16.msra.mxu2 %v3355_v61  ;;  %v3459_v61 = vld [vmem:[#allocation10 + $0x54] sm:$0xf0] }
 0x4f8   :  { %v3576_v62 = vpop.permute.xlu2 %3575 }
 0x4f9   :  { %v3578_v25 = vunpack.i.h.bf16 %v3576_v62  ;;  %v3577_v14 = vunpack.i.l.bf16 %v3576_v62 }
 0x505   :  { %v3581_v59 = vpop.permute.xlu2 %3580 }
 0x506   :  { %v3583_v52 = vunpack.i.h.bf16 %v3581_v59  ;;  %v3582_v1 = vunpack.i.l.bf16 %v3581_v59 }
 0x510   :  { %v3566_v11 = vpop.permute.xlu1 %3565 }
 0x511   :  { %v3561_v36 = vpop.permute.xlu0 %3560  ;;  %v3568_v44 = vunpack.i.h.bf16 %v3566_v11  ;;  %v3567_v5 = vunpack.i.l.bf16 %v3566_v11  ;;  %v3473_v11 = vld [vmem:[#allocation10 + $0xcc] sm:$0xf] }
 0x512   :  { %v3563_v20 = vunpack.i.h.bf16 %v3561_v36  ;;  %v3562_v7 = vunpack.i.l.bf16 %v3561_v36  ;;  %v3475_v36 = vld [vmem:[#allocation10 + $0xd4] sm:$0xf0] }
 0x514   :  { %v2442_v53 = vsel %vm1347_vm8, %v2259_v55, %v3562_v7  ;;  %v2443_v22 = vsel %vm1347_vm8, %v2371_v41, %v3563_v20  ;;  %v3331_v20 = vor.u32 %v3472_v49, %v3328_v42  ;;  %v3335_v7 = vor.u32 %v3475_v36, %v3334_v10  ;;  %v3454_v36 = vld [vmem:[#allocation10 + $0x2c] sm:$0xf0] }
 0x515   :  { %v2445_v31 = vsel %vm2444_vm11, %v2442_v53, %v3577_v14  ;;  %v2446_v47 = vsel %vm2444_vm11, %v2443_v22, %v3578_v25  ;;  %v3336_v53 = vld [vmem:[#allocation10 + $0xd8] sm:$0xf0]  ;;  %v3310_v22 = vld [vmem:[#allocation10 + $0xa0] sm:$0xf]  ;;  %v3470_v25 = vld [vmem:[#allocation10 + $0xac] sm:$0xf0]  ;;  %v3267_v42 = vor.u32 %v3456_v63, %v3264_v33  ;;  %v3271_v10 = vor.u32 %v3459_v61, %v3270_v60 }
 0x516   :  { %v2448_v21 = vsel %vm2447_vm12, %v2445_v31, %v3567_v5  ;;  %v2449_v38 = vsel %vm2447_vm12, %v2446_v47, %v3568_v44  ;;  %v3468_v14 = vld [vmem:[#allocation10 + $0xa4] sm:$0xf]  ;;  %v3312_v44 = vld [vmem:[#allocation10 + $0xb0] sm:$0xf0]  ;;  %2789 = vmatpush.bf16.msrb.mxu0 %v3331_v20  ;;  %2803 = vmatpush.bf16.msrb.mxu1 %v3335_v7  ;;  %v3311_v31 = vor.u32 %v3470_v25, %v3310_v22  ;;  %v3455_v22 = vld [vmem:[#allocation10 + $0x34] sm:$0xf0] }
 0x517   :  { %v3315_v47 = vor.u32 %v3468_v14, %v3312_v44  ;;  %v3248_v20 = vld [vmem:[#allocation10 + $0x30] sm:$0xf0]  ;;  %v3256_v25 = vld [vmem:[#allocation10 + $0x38] sm:$0xf0]  ;;  %v3247_v44 = vor.u32 %v3454_v36, %v3246_v54  ;;  %v3485_v36 = vld [vmem:[#allocation11 + $0x28] sm:$0xff] }
 0x518   :  { %2776 = vmatpush.bf16.msrb.mxu3 %v3311_v31  ;;  %v3487_v33 = vld [vmem:[#allocation11 + $0x38] sm:$0xff] }
 0x51a   :  { %2790 = vmatpush.bf16.msrb.mxu0 %v3315_v47 }
 0x51c   :  { %v3571_v32 = vpop.permute.xlu0 %3570 }
 0x51d   :  { %v3573_v13 = vunpack.i.h.bf16 %v3571_v32  ;;  %v3572_v34 = vunpack.i.l.bf16 %v3571_v32  ;;  %v3339_v32 = vor.u32 %v3473_v11, %v3336_v53  ;;  %v3275_v11 = vor.u32 %v3457_v2, %v3272_v15  ;;  %v3254_v53 = vld [vmem:[#allocation10 + $0x28] sm:$0xf]  ;;  %v3486_v15 = vld [vmem:[#allocation11 + $0x30] sm:$0xff] }
 0x51e   :  { %v3493_v2 = vld [vmem:[#allocation11 + $0x68] sm:$0xff] }
 0x51f   :  { %v2451_v57 = vsel %vm2450_vm13, %v2448_v21, %v3572_v34  ;;  %v2452_v12 = vsel %vm2450_vm13, %v2449_v38, %v3573_v13  ;;  %v3318_v13 = vld [vmem:[#allocation10 + $0xa8] sm:$0xf]  ;;  %v3471_v34 = vld [vmem:[#allocation10 + $0xb4] sm:$0xf0]  ;;  %2817 = vmatpush.bf16.msra.mxu2 %v3339_v32  ;;  %v3469_v21 = vld [vmem:[#allocation10 + $0xac] sm:$0xf] }
 0x520   :  { %v3591_v26 = vpop.permute.xlu1 %3590  ;;  %v2454_v24 = vsel %vm2453_vm14, %v2451_v57, %v3582_v1  ;;  %v2455_v29 = vsel %vm2453_vm14, %v2452_v12, %v3583_v52  ;;  %v3319_v59 = vor.u32 %v3471_v34, %v3318_v13  ;;  %v3320_v38 = vld [vmem:[#allocation10 + $0xb8] sm:$0xf0]  ;;  %v3294_v57 = vld [vmem:[#allocation10 + $0x80] sm:$0xf]  ;;  %v3464_v52 = vld [vmem:[#allocation10 + $0x84] sm:$0xf]  ;;  %v3255_v13 = vor.u32 %v3455_v22, %v3254_v53 }
 0x521   :  { %v3593_v18 = vunpack.i.h.bf16 %v3591_v26  ;;  %v3592_v27 = vunpack.i.l.bf16 %v3591_v26  ;;  %v3323_v12 = vor.u32 %v3469_v21, %v3320_v38  ;;  %v3466_v26 = vld [vmem:[#allocation10 + $0x8c] sm:$0xf0]  ;;  %v3296_v1 = vld [vmem:[#allocation10 + $0x90] sm:$0xf0]  ;;  %v3453_v32 = vld [vmem:[#allocation10 + $0x2c] sm:$0xf] }
 0x522   :  { %2804 = vmatpush.bf16.msrb.mxu1 %v3319_v59  ;;  %v3230_v34 = vld [vmem:[#allocation10] sm:$0xf]  ;;  %v3450_v59 = vld [vmem:[#allocation10 + $0xc] sm:$0xf0]  ;;  %v3448_v21 = vld [vmem:[#allocation10 + $0x4] sm:$0xf] }
 0x523   :  { %2818 = vmatpush.bf16.msra.mxu2 %v3323_v12  ;;  %v3232_v12 = vld [vmem:[#allocation10 + $0x10] sm:$0xf0]  ;;  %v3491_v22 = vld [vmem:[#allocation11 + $0x58] sm:$0xff] }
 0x524   :  { %v3586_v19 = vpop.permute.xlu0 %3585 }
 0x525   :  { %v3588_v39 = vunpack.i.h.bf16 %v3586_v19  ;;  %v3587_v8 = vunpack.i.l.bf16 %v3586_v19  ;;  %v3295_v19 = vor.u32 %v3466_v26, %v3294_v57  ;;  %v3259_v57 = vor.u32 %v3453_v32, %v3256_v25  ;;  %v3238_v26 = vld [vmem:[#allocation10 + $0x8] sm:$0xf]  ;;  %v3484_v32 = vld [vmem:[#allocation11 + $0x20] sm:$0xff] }
 0x527   :  { %v2457_v45 = vsel %vm2456_vm15, %v2454_v24, %v3587_v8  ;;  %v2458_v43 = vsel %vm2456_vm15, %v2455_v29, %v3588_v39  ;;  %v3302_v39 = vld [vmem:[#allocation10 + $0x88] sm:$0xf]  ;;  %v3467_v8 = vld [vmem:[#allocation10 + $0x94] sm:$0xf0]  ;;  %v3304_v29 = vld [vmem:[#allocation10 + $0x98] sm:$0xf0]  ;;  %2777 = vmatpush.bf16.msrb.mxu3 %v3295_v19 }
 0x528   :  { %v2460_v0 = vsel %vm2459_vm0, %v2457_v45, %v3592_v27  ;;  %v2461_v35 = vsel %vm2459_vm0, %v2458_v43, %v3593_v18  ;;  %v3465_v18 = vld [vmem:[#allocation10 + $0x8c] sm:$0xf]  ;;  %v3299_v27 = vor.u32 %v3464_v52, %v3296_v1  ;;  %v3303_v24 = vor.u32 %v3467_v8, %v3302_v39  ;;  %v3278_v45 = vld [vmem:[#allocation10 + $0x60] sm:$0xf]  ;;  %v3462_v43 = vld [vmem:[#allocation10 + $0x6c] sm:$0xf0] }
 0x529   :  { %v2462_v16 = vpack.c.bf16 %v2461_v35, %v2460_v0  ;;  %v3307_v35 = vor.u32 %v3465_v18, %v3304_v29  ;;  %v3279_v9 = vor.u32 %v3462_v43, %v3278_v45  ;;  %v3451_v52 = vld [vmem:[#allocation10 + $0x14] sm:$0xf0]  ;;  %v3449_v1 = vld [vmem:[#allocation10 + $0xc] sm:$0xf]  ;;  %v3240_v19 = vld [vmem:[#allocation10 + $0x18] sm:$0xf0]  ;;  %v3231_v18 = vor.u32 %v3450_v59, %v3230_v34 }
 0x52a   :  { %2791 = vmatpush.bf16.msrb.mxu0 %v3299_v27  ;;  %2805 = vmatpush.bf16.msrb.mxu1 %v3303_v24  ;;  %v3235_v27 = vor.u32 %v3448_v21, %v3232_v12  ;;  %v3239_v24 = vor.u32 %v3451_v52, %v3238_v26  ;;  %v3243_v45 = vor.u32 %v3449_v1, %v3240_v19 }
 0x52b   :  { %2535 = vmatmul.bf16.vlgmr.msrb.gmra.mxu2 %v2462_v16  ;;  %v3460_v16 = vld [vmem:[#allocation10 + $0x64] sm:$0xf]  ;;  %2778 = vmatpush.bf16.msrb.mxu3 %v3279_v9 }
 0x52c   :  { %2819 = vmatpush.bf16.msra.mxu2 %v3307_v35 }
 0x5ae   :  { %v2536_v28 = vpop.f32.mrf.mxu2 }
 0x5af   :  { %v5286_v3 = vadd.f32 %v3686_v4, %v2536_v28  ;;  %v3280_v28 = vld [vmem:[#allocation10 + $0x70] sm:$0xf0]  ;;  %v3286_v4 = vld [vmem:[#allocation10 + $0x68] sm:$0xf] }
 0x5b0   :  { %v3283_v37 = vor.u32 %v3460_v16, %v3280_v28 }
 0x5b1   :  { %2541 = vst [vmem:[#allocation14] sm:$0xff] %v5286_v3  ;;  %v2544_v55 = vmul.f32 %v5286_v3, %v5286_v3 }
 0x5b2   :  { %2792 = vmatpush.bf16.msrb.mxu0 %v3283_v37 }
 0x5b3   :  { %2546 = vadd.xlane.f32.xlu2 %v2544_v55 }
 0x5b6   :  { %v2538_v41 = vpop.f32.mrf.mxu2  ;;  %2793 = vmatpush.bf16.msrb.mxu0 %v3267_v42 }
 0x5b7   :  { %v5291_v50 = vadd.f32 %v3687_v58, %v2538_v41  ;;  %v3463_v41 = vld [vmem:[#allocation10 + $0x74] sm:$0xf0]  ;;  %v3461_v58 = vld [vmem:[#allocation10 + $0x6c] sm:$0xf] }
 0x5b8   :  { %v3287_v6 = vor.u32 %v3463_v41, %v3286_v4 }
 0x5b9   :  { %2542 = vst [vmem:[#allocation14 + $0x8] sm:$0xff] %v5291_v50  ;;  %v2545_v48 = vmul.f32 %v5291_v50, %v5291_v50 }
 0x5ba   :  { %2806 = vmatpush.bf16.msrb.mxu1 %v3287_v6 }
 0x5bb   :  { %2548 = vadd.xlane.f32.xlu0 %v2545_v48  ;;  %v3288_v48 = vld [vmem:[#allocation10 + $0x78] sm:$0xf0] }
 0x5be   :  { %2807 = vmatpush.bf16.msrb.mxu1 %v3271_v10  ;;  %v3492_v10 = vld [vmem:[#allocation11 + $0x60] sm:$0xff] }
 0x5c2   :  { %2808 = vmatpush.bf16.msrb.mxu1 %v3255_v13 }
 0x5c6   :  { %2809 = vmatpush.bf16.msrb.mxu1 %v3239_v24 }
 0x626   :  { %v2547_v51 = vpop.xlane.xlu2 %2546 }
 0x627   :  { %v2550_v62 = vmul.f32 %v2547_v51, %v3999_v56  ;;  %v3263_v51 = vor.u32 %v3458_v40, %v3262_v30  ;;  %v3495_v30 = vld [vmem:[#allocation11 + $0x78] sm:$0xff] }
 0x629   :  { %v5297_v5 = vadd.f32 1e-06, %v2550_v62  ;;  %v3452_v62 = vld [vmem:[#allocation10 + $0x24] sm:$0xf]  ;;  %2779 = vmatpush.bf16.msrb.mxu3 %v3263_v51 }
 0x62a   :  { %v3251_v47 = vor.u32 %v3452_v62, %v3248_v20 }
 0x62b   :  { %3666 = vrsqrt.f32 %v5297_v5  ;;  %vm2560_vm2 = vweird.f32 %v5297_v5 }
 0x62c   :  { %2794 = vmatpush.bf16.msrb.mxu0 %v3251_v47 }
 0x62d   :  { %2780 = vmatpush.bf16.msrb.mxu3 %v3247_v44 }
 0x62e   :  { %v2549_v0 = vpop.xlane.xlu0 %2548 }
 0x62f   :  { %v2551_v55 = vmul.f32 %v2549_v0, %v3999_v56  ;;  %v3291_v56 = vor.u32 %v3461_v58, %v3288_v48 }
 0x630   :  { %2795 = vmatpush.bf16.msrb.mxu0 %v3235_v27 }
 0x631   :  { %v5301_v17 = vpop.eup %3666  ;;  %v5303_v23 = vadd.f32 1e-06, %v2551_v55  ;;  %2820 = vmatpush.bf16.msra.mxu2 %v3291_v56  ;;  %2781 = vmatpush.bf16.msrb.mxu3 %v3231_v18  ;;  %v3494_v56 = vld [vmem:[#allocation11 + $0x70] sm:$0xff] }
 0x632   :  { %v2555_v46 = vmul.f32 %v5301_v17, %v5297_v5  ;;  %vm2561_vm1 = vweird.f32 %v5301_v17  ;;  %v3595_v5 = vld [vmem:[%s5399_s2] ss:$0 sm:$0xff]  ;;  %s3913_s2 = smov [#allocation14]  }
 0x633   :  { %3668 = vrsqrt.f32 %v5303_v23  ;;  %vm2562_vm3 = vmor %vm2560_vm2, %vm2561_vm1  ;;  %vm2570_vm5 = vweird.f32 %v5303_v23  ;;  %s3093_s4 = sshll.u32 %s3913_s2, 4  ;;  %s3094_s4 = int_to_ptr.vmem [resolvable:$true] %s3093_s4 }
 0x634   :  { %v2556_v49 = vmul.f32 %v5301_v17, %v2555_v46  ;;  %3058 = vmatpush.bf16.msra.mxu0 %v3495_v30  ;;  %3101 = dma.vmem_to_hbm [thread:$0]  %s3094_s4, 256, %s3096_s25, [#allocation15], %s3897_s23, %s3897_s23, %s3898_s24  }
 0x635   :  { %2821 = vmatpush.bf16.msra.mxu2 %v3275_v11  ;;  %3044 = vmatpush.bf16.msra.mxu3 %v3487_v33 }
 0x636   :  { %v2557_v7 = vmul.f32 0.5, %v2556_v49 }
 0x638   :  { %v2558_v14 = vsub.f32 1.5, %v2557_v7  ;;  %3059 = vmatpush.bf16.msra.mxu0 %v3494_v56 }
 0x639   :  { %v3669_v31 = vpop.eup %3668  ;;  %2822 = vmatpush.bf16.msra.mxu2 %v3259_v57  ;;  %3045 = vmatpush.bf16.msra.mxu3 %v3486_v15  ;;  %v3483_v57 = vld [vmem:[#allocation11 + $0x18] sm:$0xff] }
 0x63a   :  { %v2565_v38 = vmul.f32 %v3669_v31, %v5303_v23  ;;  %v2559_v39 = vmul.f32 %v5301_v17, %v2558_v14  ;;  %vm2571_vm4 = vweird.f32 %v3669_v31 }
 0x63b   :  { %vm2572_vm6 = vmor %vm2570_vm5, %vm2571_vm4 }
 0x63c   :  { %v2566_v8 = vmul.f32 %v3669_v31, %v2565_v38  ;;  %v2563_v43 = vsel %vm2562_vm3, %v5301_v17, %v2559_v39  ;;  %3060 = vmatpush.bf16.msra.mxu0 %v3493_v2  ;;  %v3490_v38 = vld [vmem:[#allocation11 + $0x50] sm:$0xff] }
 0x63d   :  { %2823 = vmatpush.bf16.msra.mxu2 %v3243_v45  ;;  %v2574_v16 = vmul.f32 %v2563_v43, %v5286_v3  ;;  %3046 = vmatpush.bf16.msra.mxu3 %v3485_v36  ;;  %v3489_v43 = vld [vmem:[#allocation11 + $0x48] sm:$0xff] }
 0x63e   :  { %v2567_v29 = vmul.f32 0.5, %v2566_v8 }
 0x63f   :  { %v2579_v55 = vmul.f32 %v3595_v5, %v2574_v16 }
 0x640   :  { %v2568_v0 = vsub.f32 1.5, %v2567_v29  ;;  %3061 = vmatpush.bf16.msra.mxu0 %v3492_v10 }
 0x641   :  { %3047 = vmatpush.bf16.msra.mxu3 %v3484_v32 }
 0x642   :  { %v2569_v35 = vmul.f32 %v3669_v31, %v2568_v0  ;;  %v3482_v0 = vld [vmem:[#allocation11 + $0x10] sm:$0xff] }
 0x644   :  { %v2573_v28 = vsel %vm2572_vm6, %v3669_v31, %v2569_v35  ;;  %3062 = vmatpush.bf16.msra.mxu0 %v3491_v22 }
 0x645   :  { %v2575_v4 = vmul.f32 %v2573_v28, %v5291_v50  ;;  %3048 = vmatpush.bf16.msra.mxu3 %v3483_v57 }
 0x647   :  { %v2580_v41 = vmul.f32 %v3595_v5, %v2575_v4 }
 0x648   :  { %3063 = vmatpush.bf16.msra.mxu0 %v3490_v38 }
 0x649   :  { %v2581_v58 = vpack.c.bf16 %v2580_v41, %v2579_v55  ;;  %3049 = vmatpush.bf16.msra.mxu3 %v3482_v0 }
 0x64b   :  { %2782 = vmatmul.bf16.vlgmr.msrb.gmra.mxu3 %v2581_v58  ;;  %2796 = vmatmul.bf16.vlgmr.msrb.gmra.mxu0 %v2581_v58 }
 0x64c   :  { %2810 = vmatmul.bf16.vlgmr.msrb.gmra.mxu1 %v2581_v58  ;;  %2824 = vmatmul.bf16.vlgmr.msra.gmra.mxu2 %v2581_v58 }
 0x64d   :  { %3064 = vmatpush.bf16.msra.mxu0 %v3489_v43 }
 0x6c8   :  { %v5320_v48 = vpop.f32.mrf.mxu0 }
 0x6c9   :  { %v3357_v9 = vmul.f32 -1.442695, %v5320_v48  ;;  %v2811_v35 = vpop.f32.mrf.mxu1 }
 0x6cb   :  { %3670 = vpow2.f32 %v3357_v9 }
 0x6ce   :  { %v5323_v3 = vpop.f32.mrf.mxu3 }
 0x6cf   :  { %v3356_v17 = vmul.f32 -1.442695, %v5323_v3  ;;  %v2825_v21 = vpop.f32.mrf.mxu2 }
 0x6d0   :  { %v5326_v23 = vpop.f32.mrf.mxu0 }
 0x6d1   :  { %v3671_v50 = vpop.eup %3670  ;;  %3672 = vpow2.f32 %v3356_v17  ;;  %v3359_v37 = vmul.f32 -1.442695, %v5326_v23 }
 0x6d2   :  { %v2843_v6 = vadd.f32 1.0, %v3671_v50 }
 0x6d3   :  { %3674 = vpow2.f32 %v3359_v37 }
 0x6d4   :  { %3676 = vrcp.f32 %v2843_v6  ;;  %v2872_v14 = vand.u32 2147483648, %v2843_v6  ;;  %vm2866_vm8 = vweird.f32 %v2843_v6  ;;  %v2870_v47 = vand.u32 2147483647, %v2843_v6 }
 0x6d6   :  { %v5329_v40 = vpop.f32.mrf.mxu3  ;;  %v2873_v26 = vor.u32 1.1754944e-38, %v2872_v14  ;;  %vm2871_vm11 = vcmp.eq.f32.partialorder %v2870_v47, 8.507059e+37 }
 0x6d7   :  { %v3673_v63 = vpop.eup %3672  ;;  %v3358_v46 = vmul.f32 -1.442695, %v5329_v40 }
 0x6d8   :  { %v5332_v60 = vadd.f32 1.0, %v3673_v63  ;;  %v3488_v63 = vld [vmem:[#allocation11 + $0x40] sm:$0xff] }
 0x6d9   :  { %v3675_v61 = vpop.eup %3674  ;;  %3678 = vpow2.f32 %v3358_v46  ;;  %v3481_v46 = vld [vmem:[#allocation11 + $0x8] sm:$0xff]  ;;  %3065 = vmatpush.bf16.msra.mxu0 %v3488_v63 }
 0x6da   :  { %v3677_v49 = vpop.eup %3676  ;;  %3680 = vrcp.f32 %v5332_v60  ;;  %v5335_v54 = vadd.f32 1.0, %v3675_v61  ;;  %v2855_v52 = vand.u32 2147483647, %v5332_v60  ;;  %v2857_v39 = vand.u32 2147483648, %v5332_v60  ;;  %3050 = vmatpush.bf16.msra.mxu3 %v3481_v46 }
 0x6db   :  { %v2862_v51 = vmul.f32 %v3677_v49, %v2843_v6  ;;  %vm2867_vm7 = vweird.f32 %v3677_v49  ;;  %vm2851_vm13 = vweird.f32 %v5332_v60 }
 0x6dc   :  { %3682 = vrcp.f32 %v5335_v54  ;;  %vm5346_vm9 = vmor %vm2866_vm8, %vm2867_vm7  ;;  %v2902_v8 = vand.u32 2147483648, %v5335_v54  ;;  %v2900_v24 = vand.u32 2147483647, %v5335_v54  ;;  %vm5367_vm15 = vcmp.eq.f32.partialorder %v2855_v52, 8.507059e+37 }
 0x6dd   :  { %v2863_v42 = vsub.f32 1.0, %v2862_v51  ;;  %vm2896_vm0 = vweird.f32 %v5335_v54  ;;  %v2858_v55 = vor.u32 1.1754944e-38, %v2857_v39 }
 0x6de   :  { %v2903_v41 = vor.u32 1.1754944e-38, %v2902_v8  ;;  %vm2901_vm2 = vcmp.eq.f32.partialorder %v2900_v24, 8.507059e+37 }
 0x6df   :  { %v3679_v62 = vpop.eup %3678  ;;  %v2864_v20 = vmul.f32 %v3677_v49, %v2863_v42 }
 0x6e0   :  { %v5338_v7 = vpop.eup %3680  ;;  %v5340_v11 = vadd.f32 1.0, %v3679_v62 }
 0x6e1   :  { %v2847_v53 = vmul.f32 %v5338_v7, %v5332_v60  ;;  %v2865_v25 = vadd.f32 %v3677_v49, %v2864_v20  ;;  %vm2852_vm10 = vweird.f32 %v5338_v7 }
 0x6e2   :  { %3684 = vrcp.f32 %v5340_v11  ;;  %v3683_v44 = vpop.eup %3682  ;;  %vm5363_vm14 = vmor %vm2851_vm13, %vm2852_vm10  ;;  %v2887_v17 = vand.u32 2147483648, %v5340_v11  ;;  %v2885_v6 = vand.u32 2147483647, %v5340_v11  ;;  %vm2881_vm4 = vweird.f32 %v5340_v11 }
 0x6e3   :  { %v2848_v31 = vsub.f32 1.0, %v2847_v53  ;;  %v2892_v13 = vmul.f32 %v3683_v44, %v5335_v54  ;;  %v2869_v12 = vsel %vm5346_vm9, %v3677_v49, %v2865_v25  ;;  %vm2897_vm12 = vweird.f32 %v3683_v44  ;;  %v3480_v54 = vld [vmem:[#allocation11] sm:$0xff] }
 0x6e4   :  { %v2874_v29 = vsel %vm2871_vm11, %v2873_v26, %v2869_v12  ;;  %vm2898_vm1 = vmor %vm2896_vm0, %vm2897_vm12  ;;  %v2888_v2 = vor.u32 1.1754944e-38, %v2887_v17  ;;  %vm2886_vm6 = vcmp.eq.f32.partialorder %v2885_v6, 8.507059e+37  ;;  %3051 = vmatpush.bf16.msra.mxu3 %v3480_v54 }
 0x6e5   :  { %v2849_v59 = vmul.f32 %v5338_v7, %v2848_v31  ;;  %v2893_v1 = vsub.f32 1.0, %v2892_v13  ;;  %v2907_v9 = vmul.f32 %v2874_v29, %v5320_v48  ;;  %v2827_v48 = vpop.f32.mrf.mxu2 }
 0x6e7   :  { %v2850_v19 = vadd.f32 %v5338_v7, %v2849_v59  ;;  %v2894_v27 = vmul.f32 %v3683_v44, %v2893_v1  ;;  %v2911_v61 = vmul.f32 %v2907_v9, %v2825_v21 }
 0x6e8   :  { %v3685_v18 = vpop.eup %3684 }
 0x6e9   :  { %v2877_v45 = vmul.f32 %v3685_v18, %v5340_v11  ;;  %v2895_v28 = vadd.f32 %v3683_v44, %v2894_v27  ;;  %v2854_v4 = vsel %vm5363_vm14, %v5338_v7, %v2850_v19  ;;  %vm2882_vm3 = vweird.f32 %v3685_v18 }
 0x6ea   :  { %v2859_v56 = vsel %vm5367_vm15, %v2858_v55, %v2854_v4  ;;  %vm2883_vm5 = vmor %vm2881_vm4, %vm2882_vm3 }
 0x6eb   :  { %v2878_v58 = vsub.f32 1.0, %v2877_v45  ;;  %v2899_v30 = vsel %vm2898_vm1, %v3683_v44, %v2895_v28  ;;  %v2906_v49 = vmul.f32 %v2859_v56, %v5323_v3 }
 0x6ec   :  { %v2904_v50 = vsel %vm2901_vm2, %v2903_v41, %v2899_v30 }
 0x6ed   :  { %v2879_v37 = vmul.f32 %v3685_v18, %v2878_v58  ;;  %v2909_v33 = vmul.f32 %v2904_v50, %v5326_v23  ;;  %v2813_v23 = vpop.f32.mrf.mxu1  ;;  %v2910_v62 = vmul.f32 %v2906_v49, %v2811_v35 }
 0x6ef   :  { %v2880_v60 = vadd.f32 %v3685_v18, %v2879_v37  ;;  %v2913_v15 = vmul.f32 %v2909_v33, %v2827_v48 }
 0x6f1   :  { %v2884_v51 = vsel %vm2883_vm5, %v3685_v18, %v2880_v60  ;;  %v2915_v10 = vpack.c.bf16 %v2913_v15, %v2911_v61 }
 0x6f2   :  { %v2889_v42 = vsel %vm2886_vm6, %v2888_v2, %v2884_v51 }
 0x6f3   :  { %v2908_v36 = vmul.f32 %v2889_v42, %v5329_v40  ;;  %3066 = vmatmul.bf16.vlgmr.msra.gmra.mxu0 %v2915_v10 }
 0x6f5   :  { %v2912_v20 = vmul.f32 %v2908_v36, %v2813_v23 }
 0x6f7   :  { %v2914_v7 = vpack.c.bf16 %v2912_v20, %v2910_v62 }
 0x6f9   :  { %3052 = vmatmul.bf16.vlgmr.msra.gmra.mxu3 %v2914_v7 }
 0x770   :  { %v3067_v3 = vpop.f32.mrf.mxu0 }
 0x778   :  { %v3069_v11 = vpop.f32.mrf.mxu0 }
 0x77c   :  { %v3053_v40 = vpop.f32.mrf.mxu3 }
 0x77d   :  { %v3068_v22 = vadd.f32 %v3067_v3, %v3053_v40 }
 0x784   :  { %v3055_v53 = vpop.f32.mrf.mxu3 }
 0x785   :  { %v3070_v32 = vadd.f32 %v3069_v11, %v3055_v53 }
 0x787   :  { %v3499_v25 = vpack.c.bf16 %v3070_v32, %v3068_v22 }
 0x789   :  { %3500 = vst [vmem:[#allocation13] sm:$0xff] %v3499_v25  }
 0x78a   :  { %3088 = dma.vmem_to_hbm [thread:$0]  %s3081_s27, 128, %s3083_s3, [#allocation4], %s3894_s15, %s3894_s15, %s3895_s16  }
 0x78b   :  { %3888 = dma.done.wait [#allocation4], 128  }
 0x78c   :  { %3889 = vsyncadd [#allocation4], 4294967168 }
 0x78d   :  { %3890 = dma.done.wait [#allocation15], 256  }
 0x78e   :  { %3891 = vsyncadd [#allocation15], 4294967040 }
 0x78f   :  { %3110 = vsyncpa [#allocation3], 1 }
 0x790   :  { %3111 = vsyncpa [#allocation6], 1 }
 0x791   :  { %3112 = vsyncpa [#allocation9], 1 }
 0x792   :  { %3113 = vsyncpa [#allocation12], 1 }
 0x793   :  { %3114 = vsyncpa [#allocation4], 1 }
 0x794   :  { %3115 = vsyncpa [#allocation15], 1 }

</bundles_post_ra>
